<compile_context>
chip_gen: v5e
topology: v5e:2x2
jax: 0.10.0
libtpu: 0.0.40
codegen_flags: <defaults>
</compile_context>

<pallas_src>
import jax
import jax.numpy as jnp
from jax import lax
from jax.experimental import pallas as pl
from jax.experimental.pallas import tpu as pltpu


# ------------------------------ helpers -------------------------------------
def _round_up(n, m):
    return ((n + m - 1) // m) * m


def weights_from_linear_mappings(linear_mappings, pos_size):
    """Replicates the training-branch weight override in forward():
       linear_mappings [..., pos_size + latent_size] -> (W_pos, W_feat),
       both in torch nn.Linear layout [out_features, in_features]."""
    lm = linear_mappings.reshape(-1, linear_mappings.shape[-1])   # [3K, D]
    return lm[:, :pos_size], lm[:, pos_size:]


def prepare_decoder_weights(w_pos, w_feat, compute_dtype=None):
    """One-time (per decoder instance / per weight update) preparation.

    Returns (W, P, pos_size, three_k):
      W: (C, Kp)  fused [W_pos.T ; W_feat.T], columns zero-padded to 128 lanes
      P: (Kp, 3)  constant channel-projection matrix, P[j, j % 3] = 1 for j < 3K
    """
    pos_size = w_pos.shape[1]
    three_k = w_pos.shape[0]
    assert w_feat.shape[0] == three_k
    C = pos_size + w_feat.shape[1]

    W = jnp.concatenate([w_pos.T, w_feat.T], axis=0)              # (C, 3K)
    Kp = max(128, _round_up(three_k, 128))
    if Kp != three_k:
        W = jnp.pad(W, ((0, 0), (0, Kp - three_k)))
    if compute_dtype is not None:                                 # e.g. bf16 on v6e/v7x
        W = W.astype(compute_dtype)

    j = jnp.arange(Kp)
    P = ((j[:, None] % 3 == jnp.arange(3)[None, :]) & (j[:, None] < three_k))
    P = P.astype(jnp.float32)                                     # (Kp, 3)

    assert W.shape == (C, Kp)
    return W, P, pos_size, three_k


def _choose_tile(N, tile_b_cap):
    # Target ~2 grid steps: enough that a "parallel" grid uses both TCs on
    # v7x, few enough that per-step overhead (~0.35 us) is negligible on
    # single-TC v5e/v6e.  Multiple of 16 keeps f32/bf16 sublane tiling legal.
    target = _round_up(pl.cdiv(N, 2), 16)
    tb = max(16, min(int(tile_b_cap), target))
    return (tb // 16) * 16


# ------------------------------- kernel -------------------------------------
def _linear_autodecoder_kernel(x_ref, cid_ref, w_ref, p_ref, o_ref):
    x = x_ref[...]                                                # (TB, C)
    w = w_ref[...]                                                # (C, Kp) lane-dense
    # Fused pos_mapping + feature_mapping matmul on the MXU, f32 accumulate.
    rgb = jnp.dot(x, w, preferred_element_type=jnp.float32)      # (TB, Kp)

    # Per-row selection of columns 3c..3c+2 with one range mask; channel
    # extraction via a tiny constant MXU projection (Kp, 3).
    base = 3 * cid_ref[...]                                       # (TB, 1) int32
    col = lax.broadcasted_iota(jnp.int32, (1, rgb.shape[1]), 1)   # (1, Kp)
    sel = (col - base).astype(jnp.uint32) < 3                     # (TB, Kp) via broadcast
    picked = jnp.where(sel, rgb, 0.0)                             # (TB, Kp)
    out = jnp.dot(picked, p_ref[...], preferred_element_type=jnp.float32)
    o_ref[...] = out.astype(o_ref.dtype)                          # (TB, 3)


# ------------------------------- wrapper ------------------------------------
def linear_autodecoder_forward(X, cluster_ids, prepared, *, tile_b=2048,
                               compute_dtype=None):
    """Eval-mode LinearAutoDecoder.forward.

    `prepared` comes from prepare_decoder_weights() (hoisted out of the hot
    path).  For the training branch, derive (w_pos, w_feat) with
    weights_from_linear_mappings and re-run prepare_decoder_weights.
    """
    W, P, pos_size, three_k = prepared
    N, C = X.shape
    Kp = W.shape[1]
    assert W.shape[0] == C
    out_dtype = X.dtype

    if compute_dtype is not None:
        X = X.astype(compute_dtype)
        assert W.dtype == compute_dtype, "pass compute_dtype to prepare_decoder_weights too"

    cid = cluster_ids.astype(jnp.int32).reshape(N, 1)

    tile_b_eff = _choose_tile(N, tile_b)
    grid = (pl.cdiv(N, tile_b_eff),)      # ragged last block handled by Pallas

    itemsize = jnp.dtype(X.dtype).itemsize
    out_itemsize = jnp.dtype(out_dtype).itemsize
    cost = pl.CostEstimate(               # useful (un-padded) work only
        flops=int(2 * N * C * three_k),
        transcendentals=0,
        bytes_accessed=int(N * C * itemsize + C * three_k * itemsize
                           + N * 4 + N * 3 * out_itemsize),
    )

    out = pl.pallas_call(
        _linear_autodecoder_kernel,
        out_shape=jax.ShapeDtypeStruct((N, 3), out_dtype),
        grid=grid,
        in_specs=[
            pl.BlockSpec((tile_b_eff, C), lambda i: (i, 0)),      # X tile
            pl.BlockSpec((tile_b_eff, 1), lambda i: (i, 0)),      # cluster ids
            pl.BlockSpec((C, Kp), lambda i: (0, 0)),              # fused weight (resident)
            pl.BlockSpec((Kp, 3), lambda i: (0, 0)),              # channel projection
        ],
        out_specs=pl.BlockSpec((tile_b_eff, 3), lambda i: (i, 0)),
        compiler_params=pltpu.CompilerParams(dimension_semantics=("parallel",)),
        cost_estimate=cost,
    )(X, cid, W, P)

    return out


# --------------------------- pure-JAX reference ------------------------------
def linear_autodecoder_reference(X, cluster_ids, w_pos, w_feat):
    pos_size = w_pos.shape[1]
    rgb = X[:, :pos_size] @ w_pos.T + X[:, pos_size:] @ w_feat.T  # (N, 3K)
    idx = 3 * cluster_ids.astype(jnp.int32)[:, None] + jnp.arange(3)[None, :]
    return jnp.take_along_axis(rgb, idx, axis=-1)                 # (N, 3)


# --------------------------------- main --------------------------------------
if __name__ == "__main__":
    # Module config (consistent with LinearAutoDecoder):
    pos_size = 48          # positional-encoding width
    latent_size = 16
    num_clusters = 8       # -> 3*num_clusters = 24 columns before the gather
    N = 1000               # NOT a multiple of the tile -> exercises the ragged last block

    key = jax.random.PRNGKey(0)
    kx, kc, km = jax.random.split(key, 3)
    X = jax.random.normal(kx, (N, pos_size + latent_size), jnp.float32)
    cluster_ids = jax.random.randint(kc, (N,), 0, num_clusters, jnp.int32)

    # Same weight source as the training branch of forward():
    linear_mappings = 0.1 * jax.random.normal(
        km, (num_clusters, 3, pos_size + latent_size), jnp.float32)
    w_pos, w_feat = weights_from_linear_mappings(linear_mappings, pos_size)

    # Hoisted, one-time weight preparation (not in the per-call hot path).
    prepared = prepare_decoder_weights(w_pos, w_feat)

    out = linear_autodecoder_forward(X, cluster_ids, prepared)
    out = jax.block_until_ready(out)

    ref = linear_autodecoder_reference(X, cluster_ids, w_pos, w_feat)
    assert out.shape == (N, 3)
    assert jnp.allclose(out, ref, atol=1e-4, rtol=1e-4), float(jnp.max(jnp.abs(out - ref)))

    print("KERNEL_OK")
</pallas_src>

<mosaic_0001>
module attributes {stable_mosaic.version = 11 : i64} {
  func.func @_linear_autodecoder_kernel(%arg0: i32, %arg1: memref<512x64xf32, #tpu.memory_space<vmem>>, %arg2: memref<512x1xi32, #tpu.memory_space<vmem>>, %arg3: memref<64x128xf32, #tpu.memory_space<vmem>>, %arg4: memref<128x3xf32, #tpu.memory_space<vmem>>, %arg5: memref<512x3xf32, #tpu.memory_space<vmem>>) attributes {dimension_semantics = [#tpu.dimension_semantics<parallel>], iteration_bounds = array<i64: 2>, scalar_prefetch = 0 : i64, scratch_operands = 0 : i64, tpu.core_type = #tpu.core_type<tc>, window_params = [{transform_indices = @transform_0, window_bounds = array<i64: 512, 64>}, {transform_indices = @transform_1, window_bounds = array<i64: 512, 1>}, {pipeline_mode = #tpu.pipeline_mode<synchronous>, transform_indices = @transform_2, window_bounds = array<i64: 64, 128>}, {pipeline_mode = #tpu.pipeline_mode<synchronous>, transform_indices = @transform_3, window_bounds = array<i64: 128, 3>}, {transform_indices = @transform_4, window_bounds = array<i64: 512, 3>}]} {
    %c0 = arith.constant 0 : index
    %c0_0 = arith.constant 0 : index
    %0 = vector.load %arg1[%c0, %c0_0] : memref<512x64xf32, #tpu.memory_space<vmem>>, vector<512x64xf32>
    %c0_1 = arith.constant 0 : index
    %c0_2 = arith.constant 0 : index
    %1 = vector.load %arg3[%c0_1, %c0_2] : memref<64x128xf32, #tpu.memory_space<vmem>>, vector<64x128xf32>
    %cst = arith.constant dense<0.000000e+00> : vector<512x128xf32>
    %2 = tpu.matmul %0, %1, %cst {dimension_numbers = #tpu.dot_dimension_numbers<[1], [0], [0], [1], [0, 0, 1, 1], [], []>} : vector<512x64xf32>, vector<64x128xf32>, vector<512x128xf32> -> vector<512x128xf32>
    %c0_3 = arith.constant 0 : index
    %c0_4 = arith.constant 0 : index
    %3 = vector.load %arg2[%c0_3, %c0_4] : memref<512x1xi32, #tpu.memory_space<vmem>>, vector<512x1xi32>
    %c3_i32 = arith.constant 3 : i32
    %4 = vector.broadcast %c3_i32 : i32 to vector<512x1xi32>
    %5 = arith.muli %4, %3 : vector<512x1xi32>
    %6 = tpu.iota {dimensions = array<i32: 1>} : vector<1x128xi32>
    %7 = vector.broadcast %6 : vector<1x128xi32> to vector<512x128xi32>
    %8 = vector.broadcast %5 : vector<512x1xi32> to vector<512x128xi32>
    %9 = arith.subi %7, %8 : vector<512x128xi32>
    %c3_i32_5 = arith.constant 3 : i32
    %10 = vector.broadcast %c3_i32_5 : i32 to vector<512x128xi32>
    %11 = arith.cmpi ult, %9, %10 : vector<512x128xi32>
    %cst_6 = arith.constant 0.000000e+00 : f32
    %12 = vector.broadcast %cst_6 : f32 to vector<512x128xf32>
    %13 = arith.select %11, %2, %12 : vector<512x128xi1>, vector<512x128xf32>
    %c0_7 = arith.constant 0 : index
    %c0_8 = arith.constant 0 : index
    %14 = vector.load %arg4[%c0_7, %c0_8] : memref<128x3xf32, #tpu.memory_space<vmem>>, vector<128x3xf32>
    %cst_9 = arith.constant dense<0.000000e+00> : vector<512x3xf32>
    %15 = tpu.matmul %13, %14, %cst_9 {dimension_numbers = #tpu.dot_dimension_numbers<[1], [0], [0], [1], [0, 0, 1, 1], [], []>} : vector<512x128xf32>, vector<128x3xf32>, vector<512x3xf32> -> vector<512x3xf32>
    %c0_10 = arith.constant 0 : index
    %c0_11 = arith.constant 0 : index
    %16 = vector.load %arg5[%c0_10, %c0_11] : memref<512x3xf32, #tpu.memory_space<vmem>>, vector<512x3xf32>
    tpu.vector_store %arg5[%c0_10, %c0_11], %15 {strides = array<i32>} : memref<512x3xf32, #tpu.memory_space<vmem>>, vector<512x3xf32>,
    return
  }
  func.func @transform_0(%arg0: i32) -> (i32, i32) {
    %c0_i32 = arith.constant 0 : i32
    %c0_i32_0 = arith.constant 0 : i32
    return %arg0, %c0_i32 : i32, i32
  }
  func.func @transform_1(%arg0: i32) -> (i32, i32) {
    %c0_i32 = arith.constant 0 : i32
    %c0_i32_0 = arith.constant 0 : i32
    return %arg0, %c0_i32 : i32, i32
  }
  func.func @transform_2(%arg0: i32) -> (i32, i32) {
    %c0_i32 = arith.constant 0 : i32
    %c0_i32_0 = arith.constant 0 : i32
    %c0_i32_1 = arith.constant 0 : i32
    return %c0_i32, %c0_i32_0 : i32, i32
  }
  func.func @transform_3(%arg0: i32) -> (i32, i32) {
    %c0_i32 = arith.constant 0 : i32
    %c0_i32_0 = arith.constant 0 : i32
    %c0_i32_1 = arith.constant 0 : i32
    return %c0_i32, %c0_i32_0 : i32, i32
  }
  func.func @transform_4(%arg0: i32) -> (i32, i32) {
    %c0_i32 = arith.constant 0 : i32
    %c0_i32_0 = arith.constant 0 : i32
    return %arg0, %c0_i32 : i32, i32
  }
}

</mosaic_0001>

<bundles_post_ra>
// kernel: tpu_custom_call.1
= control target key start
LH: loop header
LB: loop body
LE: loop exit
PB: predicated region body
PF: predicated region fallthrough
CT: control target
= control target key end

     0   :  { %s2486_s15 = smov 0   ;;  %s2488_s16 = smov 0   ;;  %s3307_s0 = inlined_call_operand.vmem [shape: f32[1000,64], index: 0, kind: input, shape index: {}]   ;;  %s3308_s1 = inlined_call_operand.vmem [shape: s32[1000,1], index: 1, kind: input, shape index: {}]   ;;  %s3309_s2 = inlined_call_operand.vmem [shape: f32[64,128], index: 2, kind: input, shape index: {}]   ;;  %s3310_s3 = inlined_call_operand.vmem [shape: f32[128,3], index: 3, kind: input, shape index: {}]   ;;  %s3311_s4 = inlined_call_operand.vmem [shape: f32[1000,3], index: 4, kind: output, shape index: {}]  }
   0x1   :  { %s2490_s17 = smov 0  }
   0x2 LB: > { %s2499_s18 = sadd.s32 4294967295, %s2426_s17   ;;  %s2501_s19 = sadd.s32 1, %s2426_s17   ;;  %s2426_s17 = sphi %s2490_s17, %s3334_s17   ;;  %s2422_s16 = sphi %s2488_s16, %s3333_s16   ;;  %s2418_s15 = sphi %s2486_s15, %s3332_s15  }
   0x3   : > { %s112_s20 = ssub.s32 %s2426_s17, %s2501_s19  ;;  %s115_s21 = sadd.s32 1, %s2422_s16 }
   0x4   : > { %p113_p0 = scmp.eq.s32.totalorder %s112_s20, 0  ;;  %p125_p1 = scmp.ne.s32.totalorder %s2422_s16, %s2418_s15 }
   0x5   : > { %p126_p2 = scmp.eq.s32.totalorder %s2499_s18, 1  ;;  %p2022_p3 = scmp.ge.s32.totalorder %s2426_s17, 1 }
   0x6   : > { %s2509_s22 = scalar_select %p113_p0, %s2422_s16, %s115_s21  }
   0x7   : > { %p2511_p4 = por %p126_p2, %p125_p1  ;;  %p190_p5 = scmp.lt.s32.totalorder %s2426_s17, 3 }
   0x9   : > { %p191_p6 = pnand %p2022_p3, %p190_p5 }
   0xb   : > { %194 = sbr.rel (%p191_p6) target bundleno = 843 (0x34b), region = 36 }
  0x10   : > { %v332_v0 = vld [vmem:[%s3309_s2 + $0x38] sm:$0xff]  ;;  %v331_v1 = vld [vmem:[%s3309_s2 + $0x30] sm:$0xff]  ;;  %s2522_s28 = sshll.u32 %s2499_s18, 6  ;;  %v2460_v2 = vmov 0   ;;  %v330_v3 = vld [vmem:[%s3309_s2 + $0x28] sm:$0xff]  ;;  %vm333_vm0 = vcmask 523264  }
  0x11   : > { %534 = vmatpush.msra.mxu0 %v332_v0  ;;  %2369 = vset.pattern.permute.xlu0 %v2460_v2  ;;  %p233_p7 = scmp.lt.s32.totalorder %s2522_s28, 124  ;;  %v329_v4 = vld [vmem:[%s3309_s2 + $0x20] sm:$0xff]  ;;  %v328_v5 = vld [vmem:[%s3309_s2 + $0x18] sm:$0xff]  ;;  %v327_v8 = vld [vmem:[%s3309_s2 + $0x10] sm:$0xff]  ;;  %s225_s27 = sand.u32 1, %s2418_s15  }
  0x12   : > { %2240 = vmatpush.msra.mxu3 %v332_v0  ;;  %2370 = vset.pattern.permute.xlu1 %v2460_v2  ;;  %v326_v11 = vld [vmem:[%s3309_s2 + $0x8] sm:$0xff]  ;;  %v325_v14 = vld [vmem:[%s3309_s2] sm:$0xff]  ;;  %s2023_s29 = sshll.u32 %s225_s27, 9 }
  0x13   : > { %535 = vmatpush.msra.mxu0 %v331_v1  ;;  %s234_s5 = scalar_select %p233_p7, %s2522_s28, 124  ;;  %2371 = vset.pattern.permute.xlu2 %v2460_v2 }
  0x14   : > { %2241 = vmatpush.msra.mxu3 %v331_v1  ;;  %s2878_s15 = scalar_lea.vmem [#allocation2], %s2023_s29  }
  0x15   : > { %536 = vmatpush.msra.mxu0 %v330_v3  ;;  %s2025_s8 = sshll.u32 %s234_s5, 3 }
  0x16   : > { %s2538_s13 = scalar_lea.vmem %s3308_s1, %s2025_s8  ;;  %2242 = vmatpush.msra.mxu3 %v330_v3  ;;  %s2551_s26 = scalar_lea.vmem %s3307_s0, %s2025_s8  ;;  %v1392_v3 = vld [vmem:[%s3310_s3 + $0x78] sm:$0xff] }
  0x17   : > { %537 = vmatpush.msra.mxu0 %v329_v4  ;;  %v766_v6 = vld [vmem:[%s2538_s13 + $0xf8] sm:$0xff]  ;;  %v767_v7 = vld [vmem:[%s2538_s13 + $0x100] sm:$0xff]  ;;  %v736_v13 = vld [vmem:[%s2538_s13 + $0x8] sm:$0xff]  ;;  %1393 = vmatpush.msra.mxu1 %v1392_v3 }
  0x18   : > { %v830_v9 = vmul.u32 3, %v766_v6  ;;  %v831_v10 = vmul.u32 3, %v767_v7  ;;  %2243 = vmatpush.msra.mxu3 %v329_v4  ;;  %v735_v12 = vld [vmem:[%s2538_s13] sm:$0xff]  ;;  %v800_v17 = vmul.u32 3, %v736_v13  ;;  %v294_v18 = vld [vmem:[%s2551_s26 + $0x108] sm:$0xff]  ;;  %v738_v21 = vld [vmem:[%s2538_s13 + $0x18] sm:$0xff]  ;;  %2248 = vmatpush.msra.mxu2 %v1392_v3 }
  0x19   : > { %538 = vmatpush.msra.mxu0 %v328_v5  ;;  %v261_v15 = vld [vmem:[%s2551_s26] sm:$0xff]  ;;  %v799_v16 = vmul.u32 3, %v735_v12  ;;  %v768_v19 = vld [vmem:[%s2538_s13 + $0x108] sm:$0xff]  ;;  %v769_v22 = vld [vmem:[%s2538_s13 + $0x110] sm:$0xff]  ;;  %v802_v24 = vmul.u32 3, %v738_v21 }
  0x1a   : > { %959 = vperm.xlu0 %2369, %v830_v9   ;;  %962 = vperm.xlu1 %2370, %v831_v10   ;;  %v832_v20 = vmul.u32 3, %v768_v19  ;;  %v262_v23 = vld [vmem:[%s2551_s26 + $0x8] sm:$0xff]  ;;  %v833_v25 = vmul.u32 3, %v769_v22  ;;  %v295_v26 = vld [vmem:[%s2551_s26 + $0x110] sm:$0xff]  ;;  %v739_v29 = vld [vmem:[%s2538_s13 + $0x20] sm:$0xff] }
  0x1b   : > { %539 = vmatpush.msra.mxu0 %v327_v8  ;;  %2244 = vmatpush.msra.mxu3 %v328_v5  ;;  %v737_v27 = vld [vmem:[%s2538_s13 + $0x10] sm:$0xff]  ;;  %v771_v30 = vld [vmem:[%s2538_s13 + $0x120] sm:$0xff]  ;;  %v803_v32 = vmul.u32 3, %v739_v29  ;;  %v296_v34 = vld [vmem:[%s2551_s26 + $0x118] sm:$0xff] }
  0x1c   : > { %965 = vperm.xlu2 %2371, %v832_v20   ;;  %v801_v28 = vmul.u32 3, %v737_v27  ;;  %v263_v31 = vld [vmem:[%s2551_s26 + $0x10] sm:$0xff]  ;;  %v835_v33 = vmul.u32 3, %v771_v30  ;;  %v772_v36 = vld [vmem:[%s2538_s13 + $0x128] sm:$0xff]  ;;  %v264_v37 = vld [vmem:[%s2551_s26 + $0x18] sm:$0xff] }
  0x1d   : > { %540 = vmatpush.msra.mxu0 %v326_v11  ;;  %2245 = vmatpush.msra.mxu3 %v327_v8  ;;  %v741_v35 = vld [vmem:[%s2538_s13 + $0x30] sm:$0xff]  ;;  %v836_v39 = vmul.u32 3, %v772_v36  ;;  %v297_v40 = vld [vmem:[%s2551_s26 + $0x120] sm:$0xff]  ;;  %v770_v41 = vld [vmem:[%s2538_s13 + $0x118] sm:$0xff] }
  0x1e   : > { %v805_v38 = vmul.u32 3, %v741_v35  ;;  %v834_v42 = vmul.u32 3, %v770_v41  ;;  %v742_v43 = vld [vmem:[%s2538_s13 + $0x38] sm:$0xff]  ;;  %v265_v44 = vld [vmem:[%s2551_s26 + $0x20] sm:$0xff]  ;;  %v298_v46 = vld [vmem:[%s2551_s26 + $0x128] sm:$0xff] }
  0x1f   : > { %541 = vmatpush.msra.mxu0 %v325_v14  ;;  %2246 = vmatpush.msra.mxu3 %v326_v11  ;;  %v806_v45 = vmul.u32 3, %v742_v43  ;;  %v740_v47 = vld [vmem:[%s2538_s13 + $0x28] sm:$0xff]  ;;  %v774_v48 = vld [vmem:[%s2538_s13 + $0x138] sm:$0xff]  ;;  %v299_v52 = vld [vmem:[%s2551_s26 + $0x130] sm:$0xff] }
  0x20   : > { %2028 = vmatmul.msk.f32.vlgmr.msra.gmra.mxu0 %vm333_vm0, %v261_v15  ;;  %v804_v49 = vmul.u32 3, %v740_v47  ;;  %v838_v50 = vmul.u32 3, %v774_v48  ;;  %v266_v51 = vld [vmem:[%s2551_s26 + $0x28] sm:$0xff]  ;;  %v775_v54 = vld [vmem:[%s2538_s13 + $0x140] sm:$0xff]  ;;  %v267_v57 = vld [vmem:[%s2551_s26 + $0x30] sm:$0xff] }
  0x21   : > { %2247 = vmatpush.msra.mxu3 %v325_v14  ;;  %v744_v53 = vld [vmem:[%s2538_s13 + $0x48] sm:$0xff]  ;;  %v839_v56 = vmul.u32 3, %v775_v54  ;;  %v300_v58 = vld [vmem:[%s2551_s26 + $0x138] sm:$0xff]  ;;  %v773_v59 = vld [vmem:[%s2538_s13 + $0x130] sm:$0xff] }
  0x22   : > { %866 = vperm.xlu0 %2369, %v799_v16   ;;  %869 = vperm.xlu1 %2370, %v800_v17   ;;  %v808_v55 = vmul.u32 3, %v744_v53  ;;  %v745_v60 = vld [vmem:[%s2538_s13 + $0x50] sm:$0xff]  ;;  %v837_v61 = vmul.u32 3, %v773_v59  ;;  %v268_v63 = vld [vmem:[%s2551_s26 + $0x38] sm:$0xff]  ;;  %v301_v0 = vld [vmem:[%s2551_s26 + $0x140] sm:$0xff] }
  0x23   : > { %2061 = vmatmul.msk.f32.vlgmr.msra.gmra.mxu3 %vm333_vm0, %v294_v18  ;;  %v809_v62 = vmul.u32 3, %v745_v60  ;;  %v743_v1 = vld [vmem:[%s2538_s13 + $0x40] sm:$0xff]  ;;  %v777_v2 = vld [vmem:[%s2538_s13 + $0x150] sm:$0xff]  ;;  %v302_v7 = vld [vmem:[%s2551_s26 + $0x148] sm:$0xff] }
  0x24   : > { %872 = vperm.xlu2 %2371, %v801_v28   ;;  %v807_v4 = vmul.u32 3, %v743_v1  ;;  %v841_v5 = vmul.u32 3, %v777_v2  ;;  %2249 = vmatpush.msrb.mxu3 %v1392_v3  ;;  %v269_v6 = vld [vmem:[%s2551_s26 + $0x40] sm:$0xff]  ;;  %v1391_v8 = vld [vmem:[%s3310_s3 + $0x70] sm:$0xff]  ;;  %v1390_v9 = vld [vmem:[%s3310_s3 + $0x68] sm:$0xff] }
  0x25   : > { %1394 = vmatpush.msra.mxu1 %v1391_v8  ;;  %v747_v10 = vld [vmem:[%s2538_s13 + $0x60] sm:$0xff]  ;;  %v778_v11 = vld [vmem:[%s2538_s13 + $0x158] sm:$0xff]  ;;  %2250 = vmatpush.msra.mxu2 %v1391_v8  ;;  %v270_v16 = vld [vmem:[%s2551_s26 + $0x48] sm:$0xff] }
  0x26   : > { %v1389_v12 = vld [vmem:[%s3310_s3 + $0x60] sm:$0xff]  ;;  %v811_v13 = vmul.u32 3, %v747_v10  ;;  %v842_v14 = vmul.u32 3, %v778_v11  ;;  %2251 = vmatpush.msrb.mxu3 %v1391_v8  ;;  %v1388_v15 = vld [vmem:[%s3310_s3 + $0x58] sm:$0xff]  ;;  %v303_v17 = vld [vmem:[%s2551_s26 + $0x150] sm:$0xff] }
  0x27   : > { %1395 = vmatpush.msra.mxu1 %v1390_v9  ;;  %2252 = vmatpush.msra.mxu2 %v1390_v9  ;;  %v1387_v18 = vld [vmem:[%s3310_s3 + $0x50] sm:$0xff]  ;;  %v1386_v19 = vld [vmem:[%s3310_s3 + $0x48] sm:$0xff]  ;;  %v1385_v22 = vld [vmem:[%s3310_s3 + $0x40] sm:$0xff] }
  0x28   : > { %2029 = vmatmul.msk.f32.gmra.mxu0 %vm333_vm0, %v262_v23  ;;  %2253 = vmatpush.msrb.mxu3 %v1390_v9  ;;  %v776_v20 = vld [vmem:[%s2538_s13 + $0x148] sm:$0xff]  ;;  %v304_v27 = vld [vmem:[%s2551_s26 + $0x158] sm:$0xff]  ;;  %v1383_v28 = vld [vmem:[%s3310_s3 + $0x30] sm:$0xff] }
  0x29   : > { %1396 = vmatpush.msra.mxu1 %v1389_v12  ;;  %2254 = vmatpush.msra.mxu2 %v1389_v12  ;;  %v748_v21 = vld [vmem:[%s2538_s13 + $0x68] sm:$0xff]  ;;  %v840_v23 = vmul.u32 3, %v776_v20  ;;  %v746_v30 = vld [vmem:[%s2538_s13 + $0x58] sm:$0xff]  ;;  %v781_v41 = vld [vmem:[%s2538_s13 + $0x170] sm:$0xff] }
  0x2a   : > { %875 = vperm.xlu1 %2370, %v802_v24   ;;  %968 = vperm.xlu0 %2369, %v833_v25   ;;  %v812_v24 = vmul.u32 3, %v748_v21  ;;  %v1384_v25 = vld [vmem:[%s3310_s3 + $0x38] sm:$0xff]  ;;  %v1382_v29 = vld [vmem:[%s3310_s3 + $0x28] sm:$0xff]  ;;  %v779_v47 = vld [vmem:[%s2538_s13 + $0x160] sm:$0xff] }
  0x2b   : > { %2062 = vmatmul.msk.f32.gmra.mxu3 %vm333_vm0, %v295_v26  ;;  %1397 = vmatpush.msra.mxu1 %v1388_v15  ;;  %v271_v26 = vld [vmem:[%s2551_s26 + $0x50] sm:$0xff]  ;;  %v1380_v35 = vld [vmem:[%s3310_s3 + $0x18] sm:$0xff]  ;;  %v751_v48 = vld [vmem:[%s2538_s13 + $0x80] sm:$0xff] }
  0x2c   : > { %971 = vperm.xlu2 %2371, %v834_v42   ;;  %2255 = vmatpush.msrb.mxu3 %v1389_v12  ;;  %v272_v36 = vld [vmem:[%s2551_s26 + $0x58] sm:$0xff]  ;;  %v1377_v42 = vld [vmem:[%s3310_s3] sm:$0xff]  ;;  %v749_v53 = vld [vmem:[%s2538_s13 + $0x70] sm:$0xff] }
  0x2d   : > { %1398 = vmatpush.msra.mxu1 %v1387_v18  ;;  %2256 = vmatpush.msra.mxu2 %v1388_v15  ;;  %v783_v54 = vld [vmem:[%s2538_s13 + $0x180] sm:$0xff]  ;;  %v275_v59 = vld [vmem:[%s2551_s26 + $0x70] sm:$0xff]  ;;  %v782_v11 = vld [vmem:[%s2538_s13 + $0x178] sm:$0xff] }
  0x2e   : > { %2257 = vmatpush.msrb.mxu3 %v1388_v15  ;;  %v309_v9 = vld [vmem:[%s2551_s26 + $0x180] sm:$0xff]  ;;  %v754_v12 = vld [vmem:[%s2538_s13 + $0x98] sm:$0xff]  ;;  %v752_v21 = vld [vmem:[%s2538_s13 + $0x88] sm:$0xff] }
  0x2f   : > { %1399 = vmatpush.msra.mxu1 %v1386_v19  ;;  %2258 = vmatpush.msra.mxu2 %v1387_v18 }
  0x30   : > { %2030 = vmatmul.msk.f32.gmra.mxu0 %vm333_vm0, %v263_v31  ;;  %2259 = vmatpush.msrb.mxu3 %v1387_v18  ;;  %v1381_v31 = vld [vmem:[%s3310_s3 + $0x20] sm:$0xff] }
  0x31   : > { %1400 = vmatpush.msra.mxu1 %v1385_v22  ;;  %2260 = vmatpush.msra.mxu2 %v1386_v19 }
  0x32   : > { %878 = vperm.xlu0 %2369, %v803_v32   ;;  %974 = vperm.xlu1 %2370, %v835_v33   ;;  %v810_v32 = vmul.u32 3, %v746_v30  ;;  %v780_v33 = vld [vmem:[%s2538_s13 + $0x168] sm:$0xff] }
  0x33   : > { %2063 = vmatmul.msk.f32.gmra.mxu3 %vm333_vm0, %v296_v34  ;;  %1401 = vmatpush.msra.mxu1 %v1384_v25  ;;  %v844_v34 = vmul.u32 3, %v780_v33  ;;  %v756_v33 = vld [vmem:[%s2538_s13 + $0xa8] sm:$0xff] }
  0x34   : > { %881 = vperm.xlu2 %2371, %v804_v49   ;;  %2261 = vmatpush.msrb.mxu3 %v1386_v19  ;;  %v843_v49 = vmul.u32 3, %v779_v47  ;;  %v310_v19 = vld [vmem:[%s2551_s26 + $0x188] sm:$0xff] }
  0x35   : > { %1402 = vmatpush.msra.mxu1 %v1383_v28  ;;  %2262 = vmatpush.msra.mxu2 %v1385_v22 }
  0x36   : > { %2263 = vmatpush.msrb.mxu3 %v1385_v22  ;;  %v786_v22 = vld [vmem:[%s2538_s13 + $0x198] sm:$0xff] }
  0x37   : > { %1403 = vmatpush.msra.mxu1 %v1382_v29  ;;  %2264 = vmatpush.msra.mxu2 %v1384_v25 }
  0x38   : > { %2031 = vmatmul.msk.f32.gmra.mxu0 %vm333_vm0, %v264_v37  ;;  %2265 = vmatpush.msrb.mxu3 %v1384_v25  ;;  %v305_v37 = vld [vmem:[%s2551_s26 + $0x160] sm:$0xff] }
  0x39   : > { %1404 = vmatpush.msra.mxu1 %v1381_v31  ;;  %2266 = vmatpush.msra.mxu2 %v1383_v28 }
  0x3a   : > { %884 = vperm.xlu1 %2370, %v805_v38   ;;  %977 = vperm.xlu0 %2369, %v836_v39   ;;  %v1379_v38 = vld [vmem:[%s3310_s3 + $0x10] sm:$0xff]  ;;  %v1378_v39 = vld [vmem:[%s3310_s3 + $0x8] sm:$0xff] }
  0x3b   : > { %2064 = vmatmul.msk.f32.gmra.mxu3 %vm333_vm0, %v297_v40  ;;  %1405 = vmatpush.msra.mxu1 %v1380_v35  ;;  %v750_v40 = vld [vmem:[%s2538_s13 + $0x78] sm:$0xff] }
  0x3c   : > { %980 = vperm.xlu2 %2371, %v837_v61   ;;  %2268 = vmatpush.msra.mxu2 %v1382_v29  ;;  %v814_v43 = vmul.u32 3, %v750_v40  ;;  %v308_v61 = vld [vmem:[%s2551_s26 + $0x178] sm:$0xff] }
  0x3d   : > { %1406 = vmatpush.msra.mxu1 %v1379_v38  ;;  %2267 = vmatpush.msrb.mxu3 %v1383_v28 }
  0x3e   : > { %2270 = vmatpush.msra.mxu2 %v1381_v31 }
  0x3f   : > { %1407 = vmatpush.msra.mxu1 %v1378_v39  ;;  %2269 = vmatpush.msrb.mxu3 %v1382_v29 }
  0x40   : > { %2032 = vmatmul.msk.f32.gmra.mxu0 %vm333_vm0, %v265_v44  ;;  %v845_v44 = vmul.u32 3, %v781_v41  ;;  %2272 = vmatpush.msra.mxu2 %v1380_v35 }
  0x41   : > { %1408 = vmatpush.msra.mxu1 %v1377_v42  ;;  %2271 = vmatpush.msrb.mxu3 %v1381_v31  ;;  %v311_v31 = vld [vmem:[%s2551_s26 + $0x190] sm:$0xff] }
  0x42   : > { %887 = vperm.xlu0 %2369, %v806_v45   ;;  %983 = vperm.xlu1 %2370, %v838_v50   ;;  %v273_v45 = vld [vmem:[%s2551_s26 + $0x60] sm:$0xff]  ;;  %v815_v50 = vmul.u32 3, %v751_v48 }
  0x43   : > { %2065 = vmatmul.msk.f32.gmra.mxu3 %vm333_vm0, %v298_v46  ;;  %2274 = vmatpush.msra.mxu2 %v1379_v38  ;;  %v306_v46 = vld [vmem:[%s2551_s26 + $0x168] sm:$0xff] }
  0x44   : > { %890 = vperm.xlu2 %2371, %v807_v4   ;;  %2273 = vmatpush.msrb.mxu3 %v1380_v35  ;;  %v820_v35 = vmul.u32 3, %v756_v33  ;;  %v316_v33 = vld [vmem:[%s2551_s26 + $0x1b8] sm:$0xff] }
  0x45   : > { %2276 = vmatpush.msra.mxu2 %v1378_v39 }
  0x46   : > { %2275 = vmatpush.msrb.mxu3 %v1379_v38  ;;  %v279_v38 = vld [vmem:[%s2551_s26 + $0x90] sm:$0xff] }
  0x47   : > { %2278 = vmatpush.msra.mxu2 %v1377_v42 }
  0x48   : > { %2033 = vmatmul.msk.f32.gmra.mxu0 %vm333_vm0, %v266_v51  ;;  %v274_v51 = vld [vmem:[%s2551_s26 + $0x68] sm:$0xff]  ;;  %2277 = vmatpush.msrb.mxu3 %v1378_v39 }
  0x4a   : > { %986 = vperm.xlu0 %2369, %v839_v56   ;;  %893 = vperm.xlu1 %2370, %v808_v55   ;;  %v813_v56 = vmul.u32 3, %v749_v53 }
  0x4b   : > { %2066 = vmatmul.msk.f32.gmra.mxu3 %vm333_vm0, %v299_v52  ;;  %v307_v52 = vld [vmem:[%s2551_s26 + $0x170] sm:$0xff] }
  0x4c   : > { %989 = vperm.xlu2 %2371, %v840_v23   ;;  %2279 = vmatpush.msrb.mxu3 %v1377_v42  ;;  %v816_v23 = vmul.u32 3, %v752_v21  ;;  %v788_v21 = vld [vmem:[%s2538_s13 + $0x1a8] sm:$0xff] }
  0x50   : > { %2034 = vmatmul.msk.f32.gmra.mxu0 %vm333_vm0, %v267_v57  ;;  %v847_v57 = vmul.u32 3, %v783_v54 }
  0x52   : > { %896 = vperm.xlu0 %2369, %v809_v62   ;;  %992 = vperm.xlu1 %2370, %v841_v5   ;;  %v276_v5 = vld [vmem:[%s2551_s26 + $0x78] sm:$0xff] }
  0x53   : > { %2067 = vmatmul.msk.f32.gmra.mxu3 %vm333_vm0, %v300_v58  ;;  %v863_v58 = vlaneseq }
  0x54   : > { %899 = vperm.xlu2 %2371, %v810_v32  }
  0x55   : > { %v2699_v62 = vand.u32 127, %v863_v58  ;;  %v755_v58 = vld [vmem:[%s2538_s13 + $0xa0] sm:$0xff] }
  0x58   : > { %2035 = vmatmul.msk.f32.gmra.mxu0 %vm333_vm0, %v268_v63  ;;  %v753_v63 = vld [vmem:[%s2538_s13 + $0x90] sm:$0xff] }
  0x59   : > { %v817_v2 = vmul.u32 3, %v753_v63 }
  0x5a   : > { %902 = vperm.xlu1 %2370, %v811_v13   ;;  %995 = vperm.xlu0 %2369, %v842_v14   ;;  %v846_v13 = vmul.u32 3, %v782_v11  ;;  %v818_v14 = vmul.u32 3, %v754_v12 }
  0x5b   : > { %2068 = vmatmul.msk.f32.gmra.mxu3 %vm333_vm0, %v301_v0  ;;  %v784_v0 = vld [vmem:[%s2538_s13 + $0x188] sm:$0xff] }
  0x5c   : > { %998 = vperm.xlu2 %2371, %v843_v49   ;;  %v848_v3 = vmul.u32 3, %v784_v0 }
  0x60   : > { %2036 = vmatmul.msk.f32.gmra.mxu0 %vm333_vm0, %v269_v6 }
  0x62   : > { %905 = vperm.xlu0 %2369, %v812_v24   ;;  %1001 = vperm.xlu1 %2370, %v844_v34   ;;  %v850_v24 = vmul.u32 3, %v786_v22  ;;  %v787_v34 = vld [vmem:[%s2538_s13 + $0x1a0] sm:$0xff]  ;;  %v760_v22 = vld [vmem:[%s2538_s13 + $0xc8] sm:$0xff] }
  0x63   : > { %2069 = vmatmul.msk.f32.gmra.mxu3 %vm333_vm0, %v302_v7 }
  0x64   : > { %908 = vperm.xlu2 %2371, %v813_v56   ;;  %v313_v56 = vld [vmem:[%s2551_s26 + $0x1a0] sm:$0xff] }
  0x68   : > { %2037 = vmatmul.msk.f32.gmra.mxu0 %vm333_vm0, %v270_v16  ;;  %v277_v16 = vld [vmem:[%s2551_s26 + $0x80] sm:$0xff] }
  0x6a   : > { %911 = vperm.xlu1 %2370, %v814_v43   ;;  %1004 = vperm.xlu0 %2369, %v845_v44   ;;  %v312_v43 = vld [vmem:[%s2551_s26 + $0x198] sm:$0xff] }
  0x6b   : > { %2070 = vmatmul.msk.f32.gmra.mxu3 %vm333_vm0, %v303_v17 }
  0x6c   : > { %1007 = vperm.xlu2 %2371, %v846_v13  }
  0x70   : > { %2038 = vmatmul.msk.f32.gmra.mxu0 %vm333_vm0, %v271_v26  ;;  %v278_v26 = vld [vmem:[%s2551_s26 + $0x88] sm:$0xff] }
  0x72   : > { %914 = vperm.xlu0 %2369, %v815_v50   ;;  %1010 = vperm.xlu1 %2370, %v847_v57   ;;  %v280_v50 = vld [vmem:[%s2551_s26 + $0x98] sm:$0xff] }
  0x73   : > { %2071 = vmatmul.msk.f32.gmra.mxu3 %vm333_vm0, %v304_v27 }
  0x74   : > { %917 = vperm.xlu2 %2371, %v816_v23   ;;  %v852_v23 = vmul.u32 3, %v788_v21 }
  0x76   : > { %v2706_v6 = vpop.permute.xlu2 %965 }
  0x78   : > { %2039 = vmatmul.msk.f32.gmra.mxu0 %vm333_vm0, %v272_v36  ;;  %v851_v36 = vmul.u32 3, %v787_v34 }
  0x7a   : > { %920 = vperm.xlu1 %2370, %v817_v2   ;;  %1013 = vperm.xlu0 %2369, %v848_v3  }
  0x7b   : > { %2072 = vmatmul.msk.f32.gmra.mxu3 %vm333_vm0, %v305_v37 }
  0x7e   : > { %v873_v18 = vpop.permute.xlu2 %872 }
  0x7f   : > { %v1059_v20 = vsub.s32 %v2699_v62, %v873_v18 }
  0x80   : > { %2040 = vmatmul.msk.f32.gmra.mxu0 %vm333_vm0, %v273_v45  ;;  %v785_v45 = vld [vmem:[%s2538_s13 + $0x190] sm:$0xff] }
  0x81   : > { %v2094_v29 = vxor.u32 2147483648, %v1059_v20  ;;  %v849_v47 = vmul.u32 3, %v785_v45 }
  0x82   : > { %923 = vperm.xlu0 %2369, %v818_v14   ;;  %1019 = vperm.xlu1 %2370, %v850_v24   ;;  %v282_v14 = vld [vmem:[%s2551_s26 + $0xa8] sm:$0xff]  ;;  %v824_v24 = vmul.u32 3, %v760_v22 }
  0x83   : > { %2073 = vmatmul.msk.f32.gmra.mxu3 %vm333_vm0, %v306_v46  ;;  %vm1129_vm3 = vcmp.lt.s32.totalorder %v2094_v29, 2147483651  ;;  %v757_v46 = vld [vmem:[%s2538_s13 + $0xb0] sm:$0xff]  ;;  %1016 = vperm.xlu2 %2371, %v849_v47   ;;  %v317_v47 = vld [vmem:[%s2551_s26 + $0x1c0] sm:$0xff] }
  0x84   : > { %v821_v48 = vmul.u32 3, %v757_v46 }
  0x86   : > { %v2733_v39 = vpop.permute.xlu2 %971 }
  0x88   : > { %2041 = vmatmul.msk.f32.gmra.mxu0 %vm333_vm0, %v274_v51 }
  0x8a   : > { %1022 = vperm.xlu0 %2369, %v851_v36   ;;  %929 = vperm.xlu1 %2370, %v820_v35   ;;  %v758_v35 = vld [vmem:[%s2538_s13 + $0xb8] sm:$0xff]  ;;  %v792_v36 = vld [vmem:[%s2538_s13 + $0x1c8] sm:$0xff] }
  0x8b   : > { %2074 = vmatmul.msk.f32.gmra.mxu3 %vm333_vm0, %v307_v52 }
  0x8c   : > { %v2692_v55 = vpop.permute.xlu0 %959  ;;  %v2695_v60 = vpop.permute.xlu1 %962 }
  0x8e   : > { %v882_v54 = vpop.permute.xlu2 %881 }
  0x8f   : > { %v1062_v57 = vsub.s32 %v2699_v62, %v882_v54 }
  0x90   : > { %2042 = vmatmul.msk.f32.gmra.mxu0 %vm333_vm0, %v275_v59  ;;  %v789_v59 = vld [vmem:[%s2538_s13 + $0x1b0] sm:$0xff] }
  0x91   : > { %v853_v63 = vmul.u32 3, %v789_v59 }
  0x92   : > { %932 = vperm.xlu0 %2369, %v821_v48  }
  0x93   : > { %2075 = vmatmul.msk.f32.gmra.mxu3 %vm333_vm0, %v308_v61  ;;  %v819_v61 = vmul.u32 3, %v755_v58  ;;  %1028 = vperm.xlu1 %2370, %v853_v63  }
  0x94   : > { %v867_v1 = vpop.permute.xlu0 %866  ;;  %v870_v8 = vpop.permute.xlu1 %869 }
  0x95   : > { %v1057_v4 = vsub.s32 %v2699_v62, %v867_v1  ;;  %v1058_v10 = vsub.s32 %v2699_v62, %v870_v8  ;;  %v281_v1 = vld [vmem:[%s2551_s26 + $0xa0] sm:$0xff]  ;;  %926 = vperm.xlu2 %2371, %v819_v61  }
  0x97   : > { %v2092_v7 = vxor.u32 2147483648, %v1057_v4  ;;  %v2093_v17 = vxor.u32 2147483648, %v1058_v10  ;;  %v2097_v4 = vxor.u32 2147483648, %v1062_v57  ;;  %v790_v10 = vld [vmem:[%s2538_s13 + $0x1b8] sm:$0xff]  ;;  %v285_v57 = vld [vmem:[%s2551_s26 + $0xc0] sm:$0xff] }
  0x98   : > { %2043 = vmatmul.msk.f32.gmra.mxu0 %vm333_vm0, %v276_v5  ;;  %v854_v12 = vmul.u32 3, %v790_v10  ;;  %v286_v10 = vld [vmem:[%s2551_s26 + $0xc8] sm:$0xff] }
  0x99   : > { %vm1123_vm1 = vcmp.lt.s32.totalorder %v2092_v7, 2147483651  ;;  %vm1126_vm2 = vcmp.lt.s32.totalorder %v2093_v17, 2147483651  ;;  %v314_v7 = vld [vmem:[%s2551_s26 + $0x1a8] sm:$0xff] }
  0x9a   : > { %vm1138_vm6 = vcmp.lt.s32.totalorder %v2097_v4, 2147483651  ;;  %1031 = vperm.xlu0 %2369, %v854_v12   ;;  %v791_v4 = vld [vmem:[%s2538_s13 + $0x1c0] sm:$0xff] }
  0x9b   : > { %2076 = vmatmul.msk.f32.gmra.mxu3 %vm333_vm0, %v309_v9  ;;  %v759_v9 = vld [vmem:[%s2538_s13 + $0xc0] sm:$0xff] }
  0x9c   : > { %v2722_v27 = vpop.permute.xlu0 %968  ;;  %v876_v30 = vpop.permute.xlu1 %875  ;;  %v823_v11 = vmul.u32 3, %v759_v9 }
  0x9d   : > { %v543_v15 = vpop.f32.mrf.mxu0  ;;  %v1060_v32 = vsub.s32 %v2699_v62, %v876_v30  ;;  %1025 = vperm.xlu2 %2371, %v852_v23  }
  0x9e   : > { %2156 = vmatmul.msk.f32.vlgmr.msra.gmra.mxu1 %vm1123_vm1, %v543_v15  ;;  %v2766_v15 = vpop.permute.xlu2 %980  ;;  %938 = vperm.xlu1 %2370, %v823_v11  }
  0x9f   : > { %v2095_v41 = vxor.u32 2147483648, %v1060_v32 }
  0xa0   : > { %2044 = vmatmul.msk.f32.gmra.mxu0 %vm333_vm0, %v277_v16 }
  0xa1   : > { %vm1132_vm4 = vcmp.lt.s32.totalorder %v2095_v41, 2147483651 }
  0xa2   : > { %941 = vperm.xlu0 %2369, %v824_v24   ;;  %v287_v24 = vld [vmem:[%s2551_s26 + $0xd0] sm:$0xff] }
  0xa3   : > { %2077 = vmatmul.msk.f32.gmra.mxu3 %vm333_vm0, %v310_v19  ;;  %v315_v19 = vld [vmem:[%s2551_s26 + $0x1b0] sm:$0xff] }
  0xa4   : > { %v879_v42 = vpop.permute.xlu0 %878  ;;  %v2744_v51 = vpop.permute.xlu1 %974 }
  0xa5   : > { %v546_v25 = vpop.f32.mrf.mxu0  ;;  %v1061_v44 = vsub.s32 %v2699_v62, %v879_v42  ;;  %v284_v42 = vld [vmem:[%s2551_s26 + $0xb8] sm:$0xff] }
  0xa6   : > { %2157 = vmatmul.msk.f32.gmra.mxu1 %vm1126_vm2, %v546_v25  ;;  %v2724_v28 = vpop.f32.mrf.mxu3  ;;  %v891_v32 = vpop.permute.xlu2 %890  ;;  %vm1602_vm2 = vcmask 23552  }
  0xa7   : > { %v2096_v53 = vxor.u32 2147483648, %v1061_v44  ;;  %v1065_v34 = vsub.s32 %v2699_v62, %v891_v32 }
  0xa8   : > { %2045 = vmatmul.msk.f32.gmra.mxu0 %vm333_vm0, %v278_v26  ;;  %v283_v26 = vld [vmem:[%s2551_s26 + $0xb0] sm:$0xff] }
  0xa9   : > { %vm1135_vm5 = vcmp.lt.s32.totalorder %v2096_v53, 2147483651  ;;  %v2100_v45 = vxor.u32 2147483648, %v1065_v34 }
  0xab   : > { %2078 = vmatmul.msk.f32.gmra.mxu3 %vm333_vm0, %v311_v31  ;;  %vm1147_vm9 = vcmp.lt.s32.totalorder %v2100_v45, 2147483651 }
  0xac   : > { %v2755_v2 = vpop.permute.xlu0 %977  ;;  %v885_v5 = vpop.permute.xlu1 %884 }
  0xad   : > { %v549_v37 = vpop.f32.mrf.mxu0  ;;  %v1063_v8 = vsub.s32 %v2699_v62, %v885_v5  ;;  %v763_v5 = vld [vmem:[%s2538_s13 + $0xe0] sm:$0xff] }
  0xae   : > { %2158 = vmatmul.msk.f32.gmra.mxu1 %vm1129_vm3, %v549_v37  ;;  %v2735_v40 = vpop.f32.mrf.mxu3  ;;  %v822_v37 = vmul.u32 3, %v758_v35  ;;  %v2799_v58 = vpop.permute.xlu2 %989  ;;  %v765_v35 = vld [vmem:[%s2538_s13 + $0xf0] sm:$0xff] }
  0xaf   : > { %v2098_v17 = vxor.u32 2147483648, %v1063_v8  ;;  %v827_v8 = vmul.u32 3, %v763_v5 }
  0xb0   : > { %2046 = vmatmul.msk.f32.gmra.mxu0 %vm333_vm0, %v279_v38  ;;  %v856_v38 = vmul.u32 3, %v792_v36  ;;  %935 = vperm.xlu2 %2371, %v822_v37   ;;  %v829_v36 = vmul.u32 3, %v765_v35 }
  0xb1   : > { %vm1141_vm7 = vcmp.lt.s32.totalorder %v2098_v17, 2147483651  ;;  %v319_v17 = vld [vmem:[%s2551_s26 + $0x1d0] sm:$0xff] }
  0xb2   : > { %1037 = vperm.xlu1 %2370, %v856_v38   ;;  %v288_v38 = vld [vmem:[%s2551_s26 + $0xd8] sm:$0xff] }
  0xb3   : > { %2079 = vmatmul.msk.f32.gmra.mxu3 %vm333_vm0, %v312_v43 }
  0xb4   : > { %v888_v18 = vpop.permute.xlu0 %887  ;;  %v2777_v29 = vpop.permute.xlu1 %983 }
  0xb5   : > { %v552_v49 = vpop.f32.mrf.mxu0  ;;  %v1064_v20 = vsub.s32 %v2699_v62, %v888_v18 }
  0xb6   : > { %2159 = vmatmul.msk.f32.gmra.mxu1 %vm1132_vm4, %v552_v49  ;;  %v2746_v52 = vpop.f32.mrf.mxu3  ;;  %v762_v49 = vld [vmem:[%s2538_s13 + $0xd8] sm:$0xff] }
  0xb7   : > { %v2099_v31 = vxor.u32 2147483648, %v1064_v20  ;;  %v826_v53 = vmul.u32 3, %v762_v49  ;;  %v764_v20 = vld [vmem:[%s2538_s13 + $0xe8] sm:$0xff] }
  0xb8   : > { %2047 = vmatmul.msk.f32.gmra.mxu0 %vm333_vm0, %v280_v50  ;;  %v793_v50 = vld [vmem:[%s2538_s13 + $0x1d0] sm:$0xff]  ;;  %v828_v22 = vmul.u32 3, %v764_v20 }
  0xb9   : > { %vm1144_vm8 = vcmp.lt.s32.totalorder %v2099_v31, 2147483651  ;;  %v857_v54 = vmul.u32 3, %v793_v50  ;;  %v291_v20 = vld [vmem:[%s2551_s26 + $0xf0] sm:$0xff] }
  0xba   : > { %947 = vperm.xlu1 %2370, %v826_v53  }
  0xbb   : > { %2080 = vmatmul.msk.f32.gmra.mxu3 %vm333_vm0, %v313_v56  ;;  %1040 = vperm.xlu0 %2369, %v857_v54   ;;  %v289_v54 = vld [vmem:[%s2551_s26 + $0xe0] sm:$0xff] }
  0xbc   : > { %v2788_v43 = vpop.permute.xlu0 %986  ;;  %v894_v46 = vpop.permute.xlu1 %893 }
  0xbd   : > { %v555_v0 = vpop.f32.mrf.mxu0  ;;  %v1066_v48 = vsub.s32 %v2699_v62, %v894_v46 }
  0xbe   : > { %2160 = vmatmul.msk.f32.gmra.mxu1 %vm1135_vm5, %v555_v0  ;;  %v2757_v3 = vpop.f32.mrf.mxu3  ;;  %v318_v0 = vld [vmem:[%s2551_s26 + $0x1c8] sm:$0xff] }
  0xbf   : > { %v2101_v61 = vxor.u32 2147483648, %v1066_v48  ;;  %v795_v48 = vld [vmem:[%s2538_s13 + $0x1e0] sm:$0xff] }
  0xc0   : > { %2048 = vmatmul.msk.f32.gmra.mxu0 %vm333_vm0, %v281_v1  ;;  %v859_v49 = vmul.u32 3, %v795_v48 }
  0xc1   : > { %vm1150_vm10 = vcmp.lt.s32.totalorder %v2101_v61, 2147483651 }
  0xc2   : > { %1046 = vperm.xlu1 %2370, %v859_v49  }
  0xc3   : > { %2081 = vmatmul.msk.f32.gmra.mxu3 %vm333_vm0, %v314_v7  ;;  %v855_v7 = vmul.u32 3, %v791_v4  ;;  %950 = vperm.xlu0 %2369, %v827_v8   ;;  %v290_v8 = vld [vmem:[%s2551_s26 + $0xe8] sm:$0xff] }
  0xc4   : > { %v897_v63 = vpop.permute.xlu0 %896  ;;  %v2810_v11 = vpop.permute.xlu1 %992 }
  0xc5   : > { %v558_v13 = vpop.f32.mrf.mxu0  ;;  %v1067_v1 = vsub.s32 %v2699_v62, %v897_v63  ;;  %1034 = vperm.xlu2 %2371, %v855_v7  }
  0xc6   : > { %2161 = vmatmul.msk.f32.gmra.mxu1 %vm1138_vm6, %v558_v13  ;;  %v2768_v16 = vpop.f32.mrf.mxu3 }
  0xc7   : > { %v2102_v13 = vxor.u32 2147483648, %v1067_v1  ;;  %v796_v1 = vld [vmem:[%s2538_s13 + $0x1e8] sm:$0xff] }
  0xc8   : > { %2049 = vmatmul.msk.f32.gmra.mxu0 %vm333_vm0, %v282_v14  ;;  %v900_v14 = vpop.permute.xlu2 %899  ;;  %v860_v4 = vmul.u32 3, %v796_v1 }
  0xc9   : > { %vm1153_vm11 = vcmp.lt.s32.totalorder %v2102_v13, 2147483651  ;;  %v1068_v18 = vsub.s32 %v2699_v62, %v900_v14 }
  0xca   : > { %1049 = vperm.xlu1 %2370, %v860_v4   ;;  %v798_v4 = vld [vmem:[%s2538_s13 + $0x1f8] sm:$0xff] }
  0xcb   : > { %2082 = vmatmul.msk.f32.gmra.mxu3 %vm333_vm0, %v315_v19  ;;  %v761_v19 = vld [vmem:[%s2538_s13 + $0xd0] sm:$0xff]  ;;  %v2103_v31 = vxor.u32 2147483648, %v1068_v18  ;;  %953 = vperm.xlu0 %2369, %v828_v22  }
  0xcc   : > { %v825_v21 = vmul.u32 3, %v761_v19  ;;  %v903_v32 = vpop.permute.xlu1 %902 }
  0xcd   : > { %v561_v25 = vpop.f32.mrf.mxu0  ;;  %vm1156_vm12 = vcmp.lt.s32.totalorder %v2103_v31, 2147483651  ;;  %v1069_v34 = vsub.s32 %v2699_v62, %v903_v32  ;;  %v324_v31 = vld [vmem:[%s2551_s26 + $0x1f8] sm:$0xff] }
  0xce   : > { %2162 = vmatmul.msk.f32.gmra.mxu1 %vm1141_vm7, %v561_v25  ;;  %v2779_v30 = vpop.f32.mrf.mxu3  ;;  %v2821_v25 = vpop.permute.xlu0 %995  ;;  %944 = vperm.xlu2 %2371, %v825_v21   ;;  %v794_v32 = vld [vmem:[%s2538_s13 + $0x1d8] sm:$0xff] }
  0xcf   : > { %v2104_v45 = vxor.u32 2147483648, %v1069_v34 }
  0xd0   : > { %2050 = vmatmul.msk.f32.gmra.mxu0 %vm333_vm0, %v283_v26 }
  0xd1   : > { %vm1159_vm13 = vcmp.lt.s32.totalorder %v2104_v45, 2147483651 }
  0xd3   : > { %2083 = vmatmul.msk.f32.gmra.mxu3 %vm333_vm0, %v316_v33  ;;  %v320_v33 = vld [vmem:[%s2551_s26 + $0x1d8] sm:$0xff]  ;;  %956 = vperm.xlu0 %2369, %v829_v36  }
  0xd4   : > { %v292_v36 = vld [vmem:[%s2551_s26 + $0xf8] sm:$0xff] }
  0xd5   : > { %v564_v41 = vpop.f32.mrf.mxu0 }
  0xd6   : > { %2163 = vmatmul.msk.f32.gmra.mxu1 %vm1144_vm8, %v564_v41  ;;  %v2790_v44 = vpop.f32.mrf.mxu3  ;;  %v2831_v41 = vpop.permute.xlu2 %998 }
  0xd7   : > { %v906_v46 = vpop.permute.xlu0 %905 }
  0xd8   : > { %2051 = vmatmul.msk.f32.gmra.mxu0 %vm333_vm0, %v284_v42  ;;  %v1070_v50 = vsub.s32 %v2699_v62, %v906_v46 }
  0xda   : > { %v2105_v61 = vxor.u32 2147483648, %v1070_v50 }
  0xdb   : > { %2084 = vmatmul.msk.f32.gmra.mxu3 %vm333_vm0, %v317_v47  ;;  %v321_v47 = vld [vmem:[%s2551_s26 + $0x1e0] sm:$0xff] }
  0xdc   : > { %vm1162_vm14 = vcmp.lt.s32.totalorder %v2105_v61, 2147483651 }
  0xdd   : > { %v567_v56 = vpop.f32.mrf.mxu0 }
  0xde   : > { %2164 = vmatmul.msk.f32.gmra.mxu1 %vm1147_vm9, %v567_v56  ;;  %v2801_v59 = vpop.f32.mrf.mxu3  ;;  %v2841_v56 = vpop.permute.xlu1 %1001 }
  0xdf   : > { %v909_v63 = vpop.permute.xlu2 %908 }
  0xe0   : > { %2052 = vmatmul.msk.f32.gmra.mxu0 %vm333_vm0, %v285_v57  ;;  %v1071_v5 = vsub.s32 %v2699_v62, %v909_v63 }
  0xe2   : > { %v2106_v13 = vxor.u32 2147483648, %v1071_v5  ;;  %v862_v5 = vmul.u32 3, %v798_v4 }
  0xe3   : > { %2085 = vmatmul.msk.f32.gmra.mxu3 %vm333_vm0, %v318_v0  ;;  %v322_v0 = vld [vmem:[%s2551_s26 + $0x1e8] sm:$0xff] }
  0xe4   : > { %vm1165_vm15 = vcmp.lt.s32.totalorder %v2106_v13, 2147483651 }
  0xe5   : > { %v570_v9 = vpop.f32.mrf.mxu0 }
  0xe6   : > { %2165 = vmatmul.msk.f32.gmra.mxu1 %vm1150_vm10, %v570_v9  ;;  %v2812_v12 = vpop.f32.mrf.mxu3  ;;  %v2851_v9 = vpop.permute.xlu0 %1004 }
  0xe7   : > { %v912_v14 = vpop.permute.xlu1 %911  ;;  %v2860_v21 = vpop.permute.xlu2 %1007 }
  0xe8   : > { %2053 = vmatmul.msk.f32.gmra.mxu0 %vm333_vm0, %v286_v10  ;;  %v1072_v18 = vsub.s32 %v2699_v62, %v912_v14 }
  0xeb   : > { %2086 = vmatmul.msk.f32.gmra.mxu3 %vm333_vm0, %v319_v17  ;;  %v323_v17 = vld [vmem:[%s2551_s26 + $0x1f0] sm:$0xff] }
  0xed   : > { %v573_v23 = vpop.f32.mrf.mxu0 }
  0xee   : > { %2166 = vmatmul.msk.f32.gmra.mxu1 %vm1153_vm11, %v573_v23  ;;  %v2823_v26 = vpop.f32.mrf.mxu3  ;;  %v2107_v23 = vxor.u32 2147483648, %v1072_v18 }
  0xef   : > { %v918_v46 = vpop.permute.xlu2 %917 }
  0xf0   : > { %2054 = vmatmul.msk.f32.gmra.mxu0 %vm333_vm0, %v287_v24  ;;  %v915_v24 = vpop.permute.xlu0 %914  ;;  %vm1168_vm1 = vcmp.lt.s32.totalorder %v2107_v23, 2147483651  ;;  %v1074_v50 = vsub.s32 %v2699_v62, %v918_v46 }
  0xf1   : > { %v1073_v34 = vsub.s32 %v2699_v62, %v915_v24 }
  0xf3   : > { %2087 = vmatmul.msk.f32.gmra.mxu3 %vm333_vm0, %v320_v33  ;;  %v858_v33 = vmul.u32 3, %v794_v32  ;;  %v2108_v45 = vxor.u32 2147483648, %v1073_v34 }
  0xf5   : > { %v576_v37 = vpop.f32.mrf.mxu0  ;;  %1043 = vperm.xlu2 %2371, %v858_v33   ;;  %vm1171_vm3 = vcmp.lt.s32.totalorder %v2108_v45, 2147483651 }
  0xf6   : > { %2167 = vmatmul.msk.f32.gmra.mxu1 %vm1156_vm12, %v576_v37  ;;  %v2833_v42 = vpop.f32.mrf.mxu3  ;;  %v2871_v37 = vpop.permute.xlu1 %1010 }
  0xf7   : > { %v2892_v14 = vpop.permute.xlu2 %1016 }
  0xf8   : > { %2055 = vmatmul.msk.f32.gmra.mxu0 %vm333_vm0, %v288_v38  ;;  %v2883_v61 = vpop.permute.xlu0 %1013 }
  0xfb   : > { %2088 = vmatmul.msk.f32.gmra.mxu3 %vm333_vm0, %v321_v47  ;;  %v797_v47 = vld [vmem:[%s2538_s13 + $0x1f0] sm:$0xff]  ;;  %s1675_s13 = ssub.s32 (%p2511_p4), 125, %s2522_s28 }
  0xfc   : > { %v861_v48 = vmul.u32 3, %v797_v47  ;;  %p1676_p8 = scmp.lt.s32.totalorder (%p2511_p4), %s1675_s13, 64 }
  0xfd   : > { %v579_v53 = vpop.f32.mrf.mxu0 }
  0xfe   : > { %2168 = vmatmul.msk.f32.gmra.mxu1 %vm1159_vm13, %v579_v53  ;;  %v2843_v57 = vpop.f32.mrf.mxu3  ;;  %1052 = vperm.xlu2 %2371, %v861_v48   ;;  %v921_v1 = vpop.permute.xlu1 %920 }
  0xff   : > { %v927_v34 = vpop.permute.xlu2 %926 }
 0x100   : > { %2056 = vmatmul.msk.f32.gmra.mxu0 %vm333_vm0, %v289_v54  ;;  %v293_v54 = vld [vmem:[%s2551_s26 + $0x100] sm:$0xff]  ;;  %s2237_s26 = sshll.u32 (%p2511_p4), %s2499_s18, 9 }
 0x101   : > { %s3172_s6 = scalar_lea.vmem (%p2511_p4), %s3311_s4, %s2237_s26  }
 0x103   : > { %2089 = vmatmul.msk.f32.gmra.mxu3 %vm333_vm0, %v322_v0  ;;  %v2109_v0 = vxor.u32 2147483648, %v1074_v50 }
 0x105   : > { %v582_v7 = vpop.f32.mrf.mxu0  ;;  %vm1174_vm4 = vcmp.lt.s32.totalorder %v2109_v0, 2147483651 }
 0x106   : > { %2169 = vmatmul.msk.f32.gmra.mxu1 %vm1162_vm14, %v582_v7  ;;  %v2853_v10 = vpop.f32.mrf.mxu3  ;;  %1055 = vperm.xlu2 %2371, %v862_v5  }
 0x107   : > { %v2913_v0 = vpop.permute.xlu2 %1025 }
 0x108   : > { %2057 = vmatmul.msk.f32.gmra.mxu0 %vm333_vm0, %v290_v8  ;;  %v1075_v8 = vsub.s32 %v2699_v62, %v921_v1 }
 0x10a   : > { %v2110_v18 = vxor.u32 2147483648, %v1075_v8 }
 0x10b   : > { %2090 = vmatmul.msk.f32.gmra.mxu3 %vm333_vm0, %v323_v17 }
 0x10d   : > { %v585_v19 = vpop.f32.mrf.mxu0 }
 0x10e   : > { %2170 = vmatmul.msk.f32.gmra.mxu1 %vm1165_vm15, %v585_v19  ;;  %v2862_v22 = vpop.f32.mrf.mxu3  ;;  %v924_v19 = vpop.permute.xlu0 %923 }
 0x10f   : > { %v1076_v23 = vsub.s32 %v2699_v62, %v924_v19 }
 0x110   : > { %2058 = vmatmul.msk.f32.gmra.mxu0 %vm333_vm0, %v291_v20 }
 0x111   : > { %v2111_v33 = vxor.u32 2147483648, %v1076_v23  ;;  %v936_v23 = vpop.permute.xlu2 %935 }
 0x113   : > { %2091 = vmatmul.msk.f32.gmra.mxu3 %vm333_vm0, %v324_v31  ;;  %v2899_v31 = vpop.permute.xlu1 %1019  ;;  %vm1180_vm5 = vcmp.lt.s32.totalorder %v2111_v33, 2147483651  ;;  %v1080_v33 = vsub.s32 %v2699_v62, %v936_v23 }
 0x115   : > { %v588_v35 = vpop.f32.mrf.mxu0 }
 0x116   : > { %2171 = vmatmul.msk.f32.gmra.mxu1 %vm1168_vm1, %v588_v35  ;;  %v2873_v38 = vpop.f32.mrf.mxu3  ;;  %v2906_v46 = vpop.permute.xlu0 %1022 }
 0x118   : > { %2059 = vmatmul.msk.f32.gmra.mxu0 %vm333_vm0, %v292_v36  ;;  %v1077_v36 = vsub.s32 %v2699_v62, %v927_v34 }
 0x11a   : > { %v2112_v48 = vxor.u32 2147483648, %v1077_v36 }
 0x11b   : > { %v1410_v49 = vpop.f32.mrf.mxu1 }
 0x11c   : > { %1603 = vst.msk [vmem:[%s2878_s15] sm:$0xff] %vm1602_vm2, %v1410_v49  ;;  %v930_v49 = vpop.permute.xlu1 %929  ;;  %vm1183_vm6 = vcmp.lt.s32.totalorder %v2112_v48, 2147483651 }
 0x11d   : > { %v591_v53 = vpop.f32.mrf.mxu0 }
 0x11e   : > { %2172 = vmatmul.msk.f32.gmra.mxu1 %vm1171_vm3, %v591_v53  ;;  %v2885_v63 = vpop.f32.mrf.mxu3  ;;  %v1078_v53 = vsub.s32 %v2699_v62, %v930_v49  ;;  %v933_v5 = vpop.permute.xlu0 %932 }
 0x11f   : > { %v1079_v8 = vsub.s32 %v2699_v62, %v933_v5 }
 0x120   : > { %2060 = vmatmul.msk.f32.gmra.mxu0 %vm333_vm0, %v293_v54  ;;  %vm1177_vm0 = vcmp.lt.s32.totalorder %v2110_v18, 2147483651  ;;  %v2113_v4 = vxor.u32 2147483648, %v1078_v53 }
 0x122   : > { %vm1186_vm7 = vcmp.lt.s32.totalorder %v2113_v4, 2147483651 }
 0x123   : > { %v1413_v7 = vpop.f32.mrf.mxu1 }
 0x124   : > { %1604 = vst.msk [vmem:[%s2878_s15 + $0x8] sm:$0xff] %vm1602_vm2, %v1413_v7  ;;  %v2920_v18 = vpop.permute.xlu1 %1028 }
 0x125   : > { %v594_v13 = vpop.f32.mrf.mxu0 }
 0x126   : > { %2173 = vmatmul.msk.f32.gmra.mxu1 %vm1174_vm4, %v594_v13  ;;  %v2894_v17 = vpop.f32.mrf.mxu3 }
 0x12b   : > { %v1416_v20 = vpop.f32.mrf.mxu1 }
 0x12c   : > { %1605 = vst.msk [vmem:[%s2878_s15 + $0x10] sm:$0xff] %vm1602_vm2, %v1416_v20  ;;  %v2114_v20 = vxor.u32 2147483648, %v1079_v8  ;;  %v939_v48 = vpop.permute.xlu1 %938 }
 0x12d   : > { %v597_v24 = vpop.f32.mrf.mxu0 }
 0x12e   : > { %2174 = vmatmul.msk.f32.gmra.mxu1 %vm1177_vm0, %v597_v24  ;;  %v2901_v32 = vpop.f32.mrf.mxu3  ;;  %vm1189_vm8 = vcmp.lt.s32.totalorder %v2114_v20, 2147483651 }
 0x133   : > { %v1419_v35 = vpop.f32.mrf.mxu1 }
 0x134   : > { %1606 = vst.msk [vmem:[%s2878_s15 + $0x18] sm:$0xff] %vm1602_vm2, %v1419_v35  ;;  %v2927_v35 = vpop.permute.xlu0 %1031  ;;  %v2941_v23 = vpop.permute.xlu1 %1037 }
 0x135   : > { %v600_v45 = vpop.f32.mrf.mxu0 }
 0x136   : > { %2175 = vmatmul.msk.f32.gmra.mxu1 %vm1180_vm5, %v600_v45  ;;  %v2908_v47 = vpop.f32.mrf.mxu3  ;;  %v2115_v45 = vxor.u32 2147483648, %v1080_v33 }
 0x138   : > { %vm1192_vm9 = vcmp.lt.s32.totalorder %v2115_v45, 2147483651 }
 0x13b   : > { %v1422_v50 = vpop.f32.mrf.mxu1 }
 0x13c   : > { %1607 = vst.msk [vmem:[%s2878_s15 + $0x20] sm:$0xff] %vm1602_vm2, %v1422_v50  ;;  %v1081_v50 = vsub.s32 %v2699_v62, %v939_v48 }
 0x13d   : > { %v603_v54 = vpop.f32.mrf.mxu0 }
 0x13e   : > { %2176 = vmatmul.msk.f32.gmra.mxu1 %vm1183_vm6, %v603_v54  ;;  %v2915_v1 = vpop.f32.mrf.mxu3  ;;  %v2934_v54 = vpop.permute.xlu2 %1034  ;;  %v2116_v5 = vxor.u32 2147483648, %v1081_v50 }
 0x140   : > { %vm1195_vm10 = vcmp.lt.s32.totalorder %v2116_v5, 2147483651 }
 0x143   : > { %v1425_v7 = vpop.f32.mrf.mxu1 }
 0x144   : > { %1608 = vst.msk [vmem:[%s2878_s15 + $0x28] sm:$0xff] %vm1602_vm2, %v1425_v7  ;;  %v942_v7 = vpop.permute.xlu0 %941 }
 0x145   : > { %v606_v13 = vpop.f32.mrf.mxu0 }
 0x146   : > { %2177 = vmatmul.msk.f32.gmra.mxu1 %vm1186_vm7, %v606_v13  ;;  %v2922_v19 = vpop.f32.mrf.mxu3  ;;  %v1082_v13 = vsub.s32 %v2699_v62, %v942_v7  ;;  %v948_v7 = vpop.permute.xlu1 %947 }
 0x148   : > { %v2117_v33 = vxor.u32 2147483648, %v1082_v13  ;;  %v1084_v13 = vsub.s32 %v2699_v62, %v948_v7 }
 0x14a   : > { %vm1198_vm11 = vcmp.lt.s32.totalorder %v2117_v33, 2147483651 }
 0x14b   : > { %v1428_v24 = vpop.f32.mrf.mxu1 }
 0x14c   : > { %1609 = vst.msk [vmem:[%s2878_s15 + $0x30] sm:$0xff] %vm1602_vm2, %v1428_v24  ;;  %v2945_v45 = vpop.permute.xlu0 %1040 }
 0x14d   : > { %v609_v34 = vpop.f32.mrf.mxu0  ;;  %3314 = vst [vmem:[#allocation4_spill] sm:$0xff] %v2945_v45 }
 0x14e   : > { %2178 = vmatmul.msk.f32.gmra.mxu1 %vm1189_vm8, %v609_v34  ;;  %v2929_v36 = vpop.f32.mrf.mxu3  ;;  %v945_v34 = vpop.permute.xlu2 %944 }
 0x153   : > { %v1431_v49 = vpop.f32.mrf.mxu1 }
 0x154   : > { %1610 = vst.msk [vmem:[%s2878_s15 + $0x38] sm:$0xff] %vm1602_vm2, %v1431_v49  ;;  %v1083_v49 = vsub.s32 %v2699_v62, %v945_v34 }
 0x155   : > { %v612_v53 = vpop.f32.mrf.mxu0 }
 0x156   : > { %2179 = vmatmul.msk.f32.gmra.mxu1 %vm1192_vm9, %v612_v53  ;;  %v2936_v4 = vpop.f32.mrf.mxu3  ;;  %v2118_v5 = vxor.u32 2147483648, %v1083_v49 }
 0x158   : > { %vm1201_vm12 = vcmp.lt.s32.totalorder %v2118_v5, 2147483651  ;;  %v2960_v5 = vpop.permute.xlu2 %1043 }
 0x159   : > { %3317 = vst [vmem:[#allocation7_spill] sm:$0xff] %v2960_v5 }
 0x15b   : > { %v1434_v8 = vpop.f32.mrf.mxu1 }
 0x15c   : > { %1611 = vst.msk [vmem:[%s2878_s15 + $0x40] sm:$0xff] %vm1602_vm2, %v1434_v8 }
 0x15d   : > { %v615_v20 = vpop.f32.mrf.mxu0 }
 0x15e   : > { %2180 = vmatmul.msk.f32.gmra.mxu1 %vm1195_vm10, %v615_v20  ;;  %v2943_v24 = vpop.f32.mrf.mxu3  ;;  %v951_v20 = vpop.permute.xlu0 %950 }
 0x15f   : > { %3313 = vst [vmem:[#allocation3_spill] sm:$0xff] %v2943_v24  ;;  %v1085_v45 = vsub.s32 %v2699_v62, %v951_v20 }
 0x163   : > { %v1437_v48 = vpop.f32.mrf.mxu1 }
 0x164   : > { %1612 = vst.msk [vmem:[%s2878_s15 + $0x48] sm:$0xff] %vm1602_vm2, %v1437_v48  ;;  %v2119_v48 = vxor.u32 2147483648, %v1084_v13 }
 0x165   : > { %v618_v50 = vpop.f32.mrf.mxu0 }
 0x166   : > { %2181 = vmatmul.msk.f32.gmra.mxu1 %vm1198_vm11, %v618_v50  ;;  %v2950_v53 = vpop.f32.mrf.mxu3  ;;  %vm1204_vm13 = vcmp.lt.s32.totalorder %v2119_v48, 2147483651  ;;  %v954_v7 = vpop.permute.xlu0 %953 }
 0x167   : > { %3315 = vst [vmem:[#allocation5_spill] sm:$0xff] %v2950_v53  ;;  %v2120_v53 = vxor.u32 2147483648, %v1085_v45 }
 0x169   : > { %vm1207_vm14 = vcmp.lt.s32.totalorder %v2120_v53, 2147483651 }
 0x16b   : > { %v1440_v8 = vpop.f32.mrf.mxu1 }
 0x16c   : > { %1613 = vst.msk [vmem:[%s2878_s15 + $0x50] sm:$0xff] %vm1602_vm2, %v1440_v8 }
 0x16d   : > { %v621_v33 = vpop.f32.mrf.mxu0 }
 0x16e   : > { %2182 = vmatmul.msk.f32.gmra.mxu1 %vm1201_vm12, %v621_v33  ;;  %v2955_v34 = vpop.f32.mrf.mxu3  ;;  %v957_v5 = vpop.permute.xlu0 %956 }
 0x16f   : > { %3316 = vst [vmem:[#allocation6_spill] sm:$0xff] %v2955_v34  ;;  %v1086_v34 = vsub.s32 %v2699_v62, %v954_v7  ;;  %v1087_v24 = vsub.s32 %v2699_v62, %v957_v5  ;;  %v1088_v5 = vsub.s32 %v2699_v62, %v2692_v55 }
 0x171   : > { %v2121_v48 = vxor.u32 2147483648, %v1086_v34 }
 0x173   : > { %v1443_v50 = vpop.f32.mrf.mxu1  ;;  %vm1210_vm15 = vcmp.lt.s32.totalorder %v2121_v48, 2147483651 }
 0x174   : > { %1614 = vst.msk [vmem:[%s2878_s15 + $0x58] sm:$0xff] %vm1602_vm2, %v1443_v50  ;;  %v1053_v50 = vpop.permute.xlu2 %1052 }
 0x175   : > { %v624_v49 = vpop.f32.mrf.mxu0  ;;  %v1119_v45 = vsub.s32 %v2699_v62, %v1053_v50 }
 0x176   : > { %2183 = vmatmul.msk.f32.gmra.mxu1 %vm1204_vm13, %v624_v49  ;;  %v2962_v8 = vpop.f32.mrf.mxu3 }
 0x17b   : > { %v1446_v33 = vpop.f32.mrf.mxu1 }
 0x17c   : > { %1615 = vst.msk [vmem:[%s2878_s15 + $0x60] sm:$0xff] %vm1602_vm2, %v1446_v33  ;;  %v2122_v33 = vxor.u32 2147483648, %v1087_v24  ;;  %v2123_v24 = vxor.u32 2147483648, %v1088_v5 }
 0x17d   : > { %v627_v13 = vpop.f32.mrf.mxu0 }
 0x17e   : > { %2184 = vmatmul.msk.f32.gmra.mxu1 %vm1207_vm14, %v627_v13  ;;  %v2967_v20 = vpop.f32.mrf.mxu3  ;;  %v2154_v13 = vxor.u32 2147483648, %v1119_v45  ;;  %vm1213_vm1 = vcmp.lt.s32.totalorder %v2122_v33, 2147483651  ;;  %vm1216_vm0 = vcmp.lt.s32.totalorder %v2123_v24, 2147483651  ;;  %v1089_v45 = vsub.s32 %v2699_v62, %v2695_v60 }
 0x17f   : > { %3318 = vst [vmem:[#allocation8_spill] sm:$0xff] %v2967_v20  ;;  %v1056_v20 = vpop.permute.xlu2 %1055  ;;  %v1091_v60 = vsub.s32 %v2699_v62, %v2722_v27  ;;  %v1093_v27 = vsub.s32 %v2699_v62, %v2744_v51  ;;  %v1095_v51 = vsub.s32 %v2699_v62, %v2766_v15  ;;  %v1097_v15 = vsub.s32 %v2699_v62, %v2788_v43 }
 0x180   : > { %vm1309_vm3 = vcmp.lt.s32.totalorder %v2154_v13, 2147483651  ;;  %v1120_v48 = vsub.s32 %v2699_v62, %v1056_v20  ;;  %v2124_v55 = vxor.u32 2147483648, %v1089_v45  ;;  %v1099_v43 = vsub.s32 %v2699_v62, %v2810_v11 }
 0x181   : > { %v1101_v11 = vsub.s32 %v2699_v62, %v2831_v41  ;;  %v1103_v41 = vsub.s32 %v2699_v62, %v2851_v9  ;;  %v1105_v9 = vsub.s32 %v2699_v62, %v2871_v37  ;;  %v1107_v37 = vsub.s32 %v2699_v62, %v2892_v14 }
 0x182   : > { %vm1219_vm5 = vcmp.lt.s32.totalorder %v2124_v55, 2147483651  ;;  %v1109_v14 = vsub.s32 %v2699_v62, %v2906_v46  ;;  %v1111_v46 = vsub.s32 %v2699_v62, %v2920_v18  ;;  %v1113_v18 = vsub.s32 %v2699_v62, %v2934_v54  ;;  %v3321_v54 = vld [vmem:[#allocation4_spill] sm:$0xff] }
 0x183   : > { %v1449_v49 = vpop.f32.mrf.mxu1 }
 0x184   : > { %1616 = vst.msk [vmem:[%s2878_s15 + $0x68] sm:$0xff] %vm1602_vm2, %v1449_v49 }
 0x185   : > { %v630_v53 = vpop.f32.mrf.mxu0 }
 0x186   : > { %2185 = vmatmul.msk.f32.gmra.mxu1 %vm1210_vm15, %v630_v53  ;;  %v2973_v7 = vpop.f32.mrf.mxu3  ;;  %v2155_v53 = vxor.u32 2147483648, %v1120_v48 }
 0x187   : > { %3319 = vst [vmem:[#allocation9_spill] sm:$0xff] %v2973_v7 }
 0x188   : > { %vm1312_vm4 = vcmp.lt.s32.totalorder %v2155_v53, 2147483651 }
 0x18b   : > { %v1452_v34 = vpop.f32.mrf.mxu1 }
 0x18c   : > { %1617 = vst.msk [vmem:[%s2878_s15 + $0x70] sm:$0xff] %vm1602_vm2, %v1452_v34  ;;  %v1090_v34 = vsub.s32 %v2699_v62, %v2706_v6  ;;  %v1092_v6 = vsub.s32 %v2699_v62, %v2733_v39  ;;  %v1094_v39 = vsub.s32 %v2699_v62, %v2755_v2  ;;  %v1096_v2 = vsub.s32 %v2699_v62, %v2777_v29 }
 0x18d   : > { %v633_v49 = vpop.f32.mrf.mxu0  ;;  %v1098_v29 = vsub.s32 %v2699_v62, %v2799_v58  ;;  %v1100_v58 = vsub.s32 %v2699_v62, %v2821_v25  ;;  %v1102_v25 = vsub.s32 %v2699_v62, %v2841_v56  ;;  %v1104_v56 = vsub.s32 %v2699_v62, %v2860_v21 }
 0x18e   : > { %2186 = vmatmul.msk.f32.gmra.mxu1 %vm1213_vm1, %v633_v49  ;;  %v729_v50 = vpop.f32.mrf.mxu3  ;;  %v2125_v48 = vxor.u32 2147483648, %v1090_v34  ;;  %v2126_v49 = vxor.u32 2147483648, %v1091_v60  ;;  %v2127_v53 = vxor.u32 2147483648, %v1092_v6  ;;  %v1106_v21 = vsub.s32 %v2699_v62, %v2883_v61 }
 0x18f   : > { %2218 = vmatmul.msk.f32.vlgmr.msrb.gmra.mxu3 %vm1309_vm3, %v729_v50  ;;  %v1108_v61 = vsub.s32 %v2699_v62, %v2899_v31  ;;  %v1110_v31 = vsub.s32 %v2699_v62, %v2913_v0  ;;  %v1112_v0 = vsub.s32 %v2699_v62, %v2927_v35  ;;  %v1114_v35 = vsub.s32 %v2699_v62, %v2941_v23  ;;  %v3323_v23 = vld [vmem:[#allocation7_spill] sm:$0xff] }
 0x190   : > { %vm1222_vm6 = vcmp.lt.s32.totalorder %v2125_v48, 2147483651  ;;  %vm1225_vm7 = vcmp.lt.s32.totalorder %v2126_v49, 2147483651  ;;  %vm1228_vm8 = vcmp.lt.s32.totalorder %v2127_v53, 2147483651 }
 0x193   : > { %v1455_v7 = vpop.f32.mrf.mxu1 }
 0x194   : > { %1618 = vst.msk [vmem:[%s2878_s15 + $0x78] sm:$0xff] %vm1602_vm2, %v1455_v7 }
 0x195   : > { %v636_v20 = vpop.f32.mrf.mxu0 }
 0x196   : > { %2187 = vmatmul.msk.f32.vlgmr.msra.gmra.mxu2 %vm1216_vm0, %v636_v20  ;;  %v732_v33 = vpop.f32.mrf.mxu3 }
 0x197   : > { %2219 = vmatmul.msk.f32.gmra.mxu3 %vm1312_vm4, %v732_v33 }
 0x19b   : > { %v1458_v13 = vpop.f32.mrf.mxu1 }
 0x19c   : > { %1619 = vst.msk [vmem:[%s2878_s15 + $0x80] sm:$0xff] %vm1602_vm2, %v1458_v13 }
 0x19d   : > { %v639_v7 = vpop.f32.mrf.mxu0 }
 0x19e   : > { %2188 = vmatmul.msk.f32.gmra.mxu2 %vm1219_vm5, %v639_v7 }
 0x1a3   : > { %v1461_v5 = vpop.f32.mrf.mxu1 }
 0x1a4   : > { %1620 = vst.msk [vmem:[%s2878_s15 + $0x88] sm:$0xff] %vm1602_vm2, %v1461_v5 }
 0x1a6   : > { %2189 = vmatmul.msk.f32.gmra.mxu2 %vm1222_vm6, %v2724_v28  ;;  %v2128_v28 = vxor.u32 2147483648, %v1093_v27 }
 0x1a8   : > { %vm1231_vm9 = vcmp.lt.s32.totalorder %v2128_v28, 2147483651 }
 0x1ab   : > { %v1464_v50 = vpop.f32.mrf.mxu1 }
 0x1ac   : > { %1621 = vst.msk [vmem:[%s2878_s15 + $0x90] sm:$0xff] %vm1602_vm2, %v1464_v50 }
 0x1ae   : > { %2190 = vmatmul.msk.f32.gmra.mxu2 %vm1225_vm7, %v2735_v40  ;;  %v2129_v40 = vxor.u32 2147483648, %v1094_v39 }
 0x1b0   : > { %vm1234_vm10 = vcmp.lt.s32.totalorder %v2129_v40, 2147483651 }
 0x1b3   : > { %v1467_v24 = vpop.f32.mrf.mxu1 }
 0x1b4   : > { %1622 = vst.msk [vmem:[%s2878_s15 + $0x98] sm:$0xff] %vm1602_vm2, %v1467_v24 }
 0x1b6   : > { %2191 = vmatmul.msk.f32.gmra.mxu2 %vm1228_vm8, %v2746_v52  ;;  %v2130_v52 = vxor.u32 2147483648, %v1095_v51 }
 0x1b8   : > { %vm1237_vm11 = vcmp.lt.s32.totalorder %v2130_v52, 2147483651  ;;  %v2149_v52 = vxor.u32 2147483648, %v1114_v35 }
 0x1bb   : > { %v1470_v45 = vpop.f32.mrf.mxu1 }
 0x1bc   : > { %1623 = vst.msk [vmem:[%s2878_s15 + $0xa0] sm:$0xff] %vm1602_vm2, %v1470_v45 }
 0x1be   : > { %2192 = vmatmul.msk.f32.gmra.mxu2 %vm1231_vm9, %v2757_v3  ;;  %v2131_v3 = vxor.u32 2147483648, %v1096_v2  ;;  %v1115_v2 = vsub.s32 %v2699_v62, %v3321_v54 }
 0x1c0   : > { %vm1240_vm12 = vcmp.lt.s32.totalorder %v2131_v3, 2147483651  ;;  %v2150_v3 = vxor.u32 2147483648, %v1115_v2 }
 0x1c3   : > { %v1473_v20 = vpop.f32.mrf.mxu1 }
 0x1c4   : > { %1624 = vst.msk [vmem:[%s2878_s15 + $0xa8] sm:$0xff] %vm1602_vm2, %v1473_v20 }
 0x1c6   : > { %2193 = vmatmul.msk.f32.gmra.mxu2 %vm1234_vm10, %v2768_v16  ;;  %v2132_v16 = vxor.u32 2147483648, %v1097_v15  ;;  %v1116_v15 = vsub.s32 %v2699_v62, %v3323_v23 }
 0x1c8   : > { %vm1243_vm13 = vcmp.lt.s32.totalorder %v2132_v16, 2147483651  ;;  %v3324_v16 = vld [vmem:[#allocation6_spill] sm:$0xff] }
 0x1cb   : > { %v1476_v33 = vpop.f32.mrf.mxu1 }
 0x1cc   : > { %1625 = vst.msk [vmem:[%s2878_s15 + $0xb0] sm:$0xff] %vm1602_vm2, %v1476_v33 }
 0x1ce   : > { %2194 = vmatmul.msk.f32.gmra.mxu2 %vm1237_vm11, %v2779_v30  ;;  %v2133_v30 = vxor.u32 2147483648, %v1098_v29  ;;  %v2151_v29 = vxor.u32 2147483648, %v1116_v15 }
 0x1d0   : > { %vm1246_vm14 = vcmp.lt.s32.totalorder %v2133_v30, 2147483651 }
 0x1d3   : > { %v1479_v55 = vpop.f32.mrf.mxu1 }
 0x1d4   : > { %1626 = vst.msk [vmem:[%s2878_s15 + $0xb8] sm:$0xff] %vm1602_vm2, %v1479_v55 }
 0x1d6   : > { %2195 = vmatmul.msk.f32.gmra.mxu2 %vm1240_vm12, %v2790_v44  ;;  %v2134_v44 = vxor.u32 2147483648, %v1099_v43 }
 0x1d8   : > { %vm1249_vm15 = vcmp.lt.s32.totalorder %v2134_v44, 2147483651 }
 0x1db   : > { %v1482_v13 = vpop.f32.mrf.mxu1 }
 0x1dc   : > { %1627 = vst.msk [vmem:[%s2878_s15 + $0xc0] sm:$0xff] %vm1602_vm2, %v1482_v13  ;;  %v1047_v13 = vpop.permute.xlu1 %1046 }
 0x1de   : > { %2196 = vmatmul.msk.f32.gmra.mxu2 %vm1243_vm13, %v2801_v59  ;;  %v2135_v59 = vxor.u32 2147483648, %v1100_v58 }
 0x1e0   : > { %vm1252_vm1 = vcmp.lt.s32.totalorder %v2135_v59, 2147483651  ;;  %v3325_v59 = vld [vmem:[#allocation8_spill] sm:$0xff] }
 0x1e3   : > { %v1485_v34 = vpop.f32.mrf.mxu1 }
 0x1e4   : > { %1628 = vst.msk [vmem:[%s2878_s15 + $0xc8] sm:$0xff] %vm1602_vm2, %v1485_v34  ;;  %v1117_v34 = vsub.s32 %v2699_v62, %v1047_v13 }
 0x1e6   : > { %2197 = vmatmul.msk.f32.gmra.mxu2 %vm1246_vm14, %v2812_v12  ;;  %v2136_v12 = vxor.u32 2147483648, %v1101_v11  ;;  %v2152_v43 = vxor.u32 2147483648, %v1117_v34 }
 0x1e8   : > { %vm1255_vm3 = vcmp.lt.s32.totalorder %v2136_v12, 2147483651 }
 0x1eb   : > { %v1488_v7 = vpop.f32.mrf.mxu1 }
 0x1ec   : > { %1629 = vst.msk [vmem:[%s2878_s15 + $0xd0] sm:$0xff] %vm1602_vm2, %v1488_v7  ;;  %v1050_v7 = vpop.permute.xlu1 %1049 }
 0x1ed   : > { %v1118_v58 = vsub.s32 %v2699_v62, %v1050_v7 }
 0x1ee   : > { %2198 = vmatmul.msk.f32.gmra.mxu2 %vm1249_vm15, %v2823_v26  ;;  %v2137_v26 = vxor.u32 2147483648, %v1102_v25  ;;  %vm1294_vm15 = vcmp.lt.s32.totalorder %v2149_v52, 2147483651 }
 0x1f0   : > { %vm1258_vm4 = vcmp.lt.s32.totalorder %v2137_v26, 2147483651 }
 0x1f3   : > { %v1491_v48 = vpop.f32.mrf.mxu1 }
 0x1f4   : > { %1630 = vst.msk [vmem:[%s2878_s15 + $0xd8] sm:$0xff] %vm1602_vm2, %v1491_v48  ;;  %v2153_v48 = vxor.u32 2147483648, %v1118_v58 }
 0x1f6   : > { %2199 = vmatmul.msk.f32.gmra.mxu2 %vm1252_vm1, %v2833_v42  ;;  %v2138_v42 = vxor.u32 2147483648, %v1103_v41  ;;  %vm1297_vm1 = vcmp.lt.s32.totalorder %v2150_v3, 2147483651 }
 0x1f8   : > { %vm1261_vm0 = vcmp.lt.s32.totalorder %v2138_v42, 2147483651 }
 0x1fb   : > { %v1494_v5 = vpop.f32.mrf.mxu1 }
 0x1fc   : > { %1631 = vst.msk [vmem:[%s2878_s15 + $0xe0] sm:$0xff] %vm1602_vm2, %v1494_v5 }
 0x1fe   : > { %2200 = vmatmul.msk.f32.gmra.mxu2 %vm1255_vm3, %v2843_v57  ;;  %v2139_v57 = vxor.u32 2147483648, %v1104_v56  ;;  %vm1300_vm3 = vcmp.lt.s32.totalorder %v2151_v29, 2147483651 }
 0x200   : > { %vm1264_vm5 = vcmp.lt.s32.totalorder %v2139_v57, 2147483651 }
 0x203   : > { %v1497_v60 = vpop.f32.mrf.mxu1 }
 0x204   : > { %1632 = vst.msk [vmem:[%s2878_s15 + $0xe8] sm:$0xff] %vm1602_vm2, %v1497_v60 }
 0x206   : > { %2201 = vmatmul.msk.f32.gmra.mxu2 %vm1258_vm4, %v2853_v10  ;;  %v2140_v10 = vxor.u32 2147483648, %v1105_v9  ;;  %vm1303_vm4 = vcmp.lt.s32.totalorder %v2152_v43, 2147483651 }
 0x208   : > { %vm1267_vm6 = vcmp.lt.s32.totalorder %v2140_v10, 2147483651 }
 0x20b   : > { %v1500_v49 = vpop.f32.mrf.mxu1 }
 0x20c   : > { %1633 = vst.msk [vmem:[%s2878_s15 + $0xf0] sm:$0xff] %vm1602_vm2, %v1500_v49 }
 0x20e   : > { %2202 = vmatmul.msk.f32.gmra.mxu2 %vm1261_vm0, %v2862_v22  ;;  %v2141_v22 = vxor.u32 2147483648, %v1106_v21  ;;  %vm1306_vm0 = vcmp.lt.s32.totalorder %v2153_v48, 2147483651 }
 0x210   : > { %vm1270_vm7 = vcmp.lt.s32.totalorder %v2141_v22, 2147483651 }
 0x212   : > { %v1596_v50 = vpop.f32.mrf.mxu3 }
 0x213   : > { %1665 = vst.msk [vmem:[%s2878_s15 + $0x1f0] sm:$0xff] %vm1602_vm2, %v1596_v50 }
 0x216   : > { %2203 = vmatmul.msk.f32.gmra.mxu2 %vm1264_vm5, %v2873_v38  ;;  %v2142_v38 = vxor.u32 2147483648, %v1107_v37 }
 0x218   : > { %vm1273_vm8 = vcmp.lt.s32.totalorder %v2142_v38, 2147483651 }
 0x219   : > { %v1503_v6 = vpop.f32.mrf.mxu2 }
 0x21a   : > { %1634 = vst.msk [vmem:[%s2878_s15 + $0xf8] sm:$0xff] %vm1602_vm2, %v1503_v6  ;;  %v1599_v53 = vpop.f32.mrf.mxu3 }
 0x21b   : > { %1666 = vst.msk [vmem:[%s2878_s15 + $0x1f8] sm:$0xff] %vm1602_vm2, %v1599_v53 }
 0x21e   : > { %2204 = vmatmul.msk.f32.gmra.mxu2 %vm1267_vm6, %v2885_v63  ;;  %v2143_v63 = vxor.u32 2147483648, %v1108_v61 }
 0x220   : > { %vm1276_vm9 = vcmp.lt.s32.totalorder %v2143_v63, 2147483651 }
 0x221   : > { %v1506_v24 = vpop.f32.mrf.mxu2 }
 0x222   : > { %1635 = vst.msk [vmem:[%s2878_s15 + $0x100] sm:$0xff] %vm1602_vm2, %v1506_v24 }
 0x226   : > { %2205 = vmatmul.msk.f32.gmra.mxu2 %vm1270_vm7, %v2894_v17  ;;  %v2144_v17 = vxor.u32 2147483648, %v1109_v14 }
 0x228   : > { %vm1279_vm10 = vcmp.lt.s32.totalorder %v2144_v17, 2147483651 }
 0x229   : > { %v1509_v27 = vpop.f32.mrf.mxu2 }
 0x22a   : > { %1636 = vst.msk [vmem:[%s2878_s15 + $0x108] sm:$0xff] %vm1602_vm2, %v1509_v27 }
 0x22e   : > { %2206 = vmatmul.msk.f32.gmra.mxu2 %vm1273_vm8, %v2901_v32  ;;  %v2145_v32 = vxor.u32 2147483648, %v1110_v31 }
 0x230   : > { %vm1282_vm11 = vcmp.lt.s32.totalorder %v2145_v32, 2147483651 }
 0x231   : > { %v1512_v28 = vpop.f32.mrf.mxu2 }
 0x232   : > { %1637 = vst.msk [vmem:[%s2878_s15 + $0x110] sm:$0xff] %vm1602_vm2, %v1512_v28 }
 0x236   : > { %2207 = vmatmul.msk.f32.gmra.mxu2 %vm1276_vm9, %v2908_v47  ;;  %v2146_v47 = vxor.u32 2147483648, %v1111_v46 }
 0x238   : > { %vm1285_vm12 = vcmp.lt.s32.totalorder %v2146_v47, 2147483651 }
 0x239   : > { %v1515_v45 = vpop.f32.mrf.mxu2 }
 0x23a   : > { %1638 = vst.msk [vmem:[%s2878_s15 + $0x118] sm:$0xff] %vm1602_vm2, %v1515_v45 }
 0x23e   : > { %2208 = vmatmul.msk.f32.gmra.mxu2 %vm1279_vm10, %v2915_v1  ;;  %v2147_v1 = vxor.u32 2147483648, %v1112_v0 }
 0x240   : > { %vm1288_vm13 = vcmp.lt.s32.totalorder %v2147_v1, 2147483651 }
 0x241   : > { %v1518_v39 = vpop.f32.mrf.mxu2 }
 0x242   : > { %1639 = vst.msk [vmem:[%s2878_s15 + $0x120] sm:$0xff] %vm1602_vm2, %v1518_v39 }
 0x246   : > { %2209 = vmatmul.msk.f32.gmra.mxu2 %vm1282_vm11, %v2922_v19  ;;  %v2148_v19 = vxor.u32 2147483648, %v1113_v18 }
 0x248   : > { %vm1291_vm14 = vcmp.lt.s32.totalorder %v2148_v19, 2147483651 }
 0x249   : > { %v1521_v40 = vpop.f32.mrf.mxu2 }
 0x24a   : > { %1640 = vst.msk [vmem:[%s2878_s15 + $0x128] sm:$0xff] %vm1602_vm2, %v1521_v40 }
 0x24e   : > { %2210 = vmatmul.msk.f32.gmra.mxu2 %vm1285_vm12, %v2929_v36  ;;  %v3320_v36 = vld [vmem:[#allocation3_spill] sm:$0xff] }
 0x251   : > { %v1524_v20 = vpop.f32.mrf.mxu2 }
 0x252   : > { %1641 = vst.msk [vmem:[%s2878_s15 + $0x130] sm:$0xff] %vm1602_vm2, %v1524_v20 }
 0x256   : > { %2211 = vmatmul.msk.f32.gmra.mxu2 %vm1288_vm13, %v2936_v4  ;;  %v3322_v4 = vld [vmem:[#allocation5_spill] sm:$0xff] }
 0x259   : > { %v1527_v51 = vpop.f32.mrf.mxu2 }
 0x25a   : > { %1642 = vst.msk [vmem:[%s2878_s15 + $0x138] sm:$0xff] %vm1602_vm2, %v1527_v51 }
 0x25e   : > { %2212 = vmatmul.msk.f32.gmra.mxu2 %vm1291_vm14, %v3320_v36 }
 0x261   : > { %v1530_v33 = vpop.f32.mrf.mxu2 }
 0x262   : > { %1643 = vst.msk [vmem:[%s2878_s15 + $0x140] sm:$0xff] %vm1602_vm2, %v1530_v33 }
 0x266   : > { %2213 = vmatmul.msk.f32.gmra.mxu2 %vm1294_vm15, %v3322_v4 }
 0x269   : > { %v1533_v55 = vpop.f32.mrf.mxu2 }
 0x26a   : > { %1644 = vst.msk [vmem:[%s2878_s15 + $0x148] sm:$0xff] %vm1602_vm2, %v1533_v55 }
 0x26e   : > { %2214 = vmatmul.msk.f32.gmra.mxu2 %vm1297_vm1, %v3324_v16 }
 0x271   : > { %v1536_v30 = vpop.f32.mrf.mxu2 }
 0x272   : > { %1645 = vst.msk [vmem:[%s2878_s15 + $0x150] sm:$0xff] %vm1602_vm2, %v1536_v30 }
 0x276   : > { %2215 = vmatmul.msk.f32.gmra.mxu2 %vm1300_vm3, %v2962_v8  ;;  %v3326_v8 = vld [vmem:[#allocation9_spill] sm:$0xff] }
 0x279   : > { %v1539_v44 = vpop.f32.mrf.mxu2 }
 0x27a   : > { %1646 = vst.msk [vmem:[%s2878_s15 + $0x158] sm:$0xff] %vm1602_vm2, %v1539_v44 }
 0x27e   : > { %2216 = vmatmul.msk.f32.gmra.mxu2 %vm1303_vm4, %v3325_v59 }
 0x281   : > { %v1542_v11 = vpop.f32.mrf.mxu2 }
 0x282   : > { %1647 = vst.msk [vmem:[%s2878_s15 + $0x160] sm:$0xff] %vm1602_vm2, %v1542_v11 }
 0x286   : > { %2217 = vmatmul.msk.f32.gmra.mxu2 %vm1306_vm0, %v3326_v8 }
 0x289   : > { %v1545_v12 = vpop.f32.mrf.mxu2 }
 0x28a   : > { %1648 = vst.msk [vmem:[%s2878_s15 + $0x168] sm:$0xff] %vm1602_vm2, %v1545_v12 }
 0x291   : > { %v1548_v5 = vpop.f32.mrf.mxu2 }
 0x292   : > { %1649 = vst.msk [vmem:[%s2878_s15 + $0x170] sm:$0xff] %vm1602_vm2, %v1548_v5 }
 0x299   : > { %v1551_v62 = vpop.f32.mrf.mxu2 }
 0x29a   : > { %1650 = vst.msk [vmem:[%s2878_s15 + $0x178] sm:$0xff] %vm1602_vm2, %v1551_v62 }
 0x2a1   : > { %v1554_v25 = vpop.f32.mrf.mxu2 }
 0x2a2   : > { %1651 = vst.msk [vmem:[%s2878_s15 + $0x180] sm:$0xff] %vm1602_vm2, %v1554_v25 }
 0x2a9   : > { %v1557_v26 = vpop.f32.mrf.mxu2 }
 0x2aa   : > { %1652 = vst.msk [vmem:[%s2878_s15 + $0x188] sm:$0xff] %vm1602_vm2, %v1557_v26 }
 0x2b1   : > { %v1560_v60 = vpop.f32.mrf.mxu2 }
 0x2b2   : > { %1653 = vst.msk [vmem:[%s2878_s15 + $0x190] sm:$0xff] %vm1602_vm2, %v1560_v60 }
 0x2b9   : > { %v1563_v41 = vpop.f32.mrf.mxu2 }
 0x2ba   : > { %1654 = vst.msk [vmem:[%s2878_s15 + $0x198] sm:$0xff] %vm1602_vm2, %v1563_v41 }
 0x2c1   : > { %v1566_v42 = vpop.f32.mrf.mxu2 }
 0x2c2   : > { %1655 = vst.msk [vmem:[%s2878_s15 + $0x1a0] sm:$0xff] %vm1602_vm2, %v1566_v42 }
 0x2c9   : > { %v1569_v49 = vpop.f32.mrf.mxu2 }
 0x2ca   : > { %1656 = vst.msk [vmem:[%s2878_s15 + $0x1a8] sm:$0xff] %vm1602_vm2, %v1569_v49 }
 0x2d1   : > { %v1572_v56 = vpop.f32.mrf.mxu2 }
 0x2d2   : > { %1657 = vst.msk [vmem:[%s2878_s15 + $0x1b0] sm:$0xff] %vm1602_vm2, %v1572_v56 }
 0x2d9   : > { %v1575_v57 = vpop.f32.mrf.mxu2 }
 0x2da   : > { %1658 = vst.msk [vmem:[%s2878_s15 + $0x1b8] sm:$0xff] %vm1602_vm2, %v1575_v57 }
 0x2e1   : > { %v1578_v50 = vpop.f32.mrf.mxu2 }
 0x2e2   : > { %1659 = vst.msk [vmem:[%s2878_s15 + $0x1c0] sm:$0xff] %vm1602_vm2, %v1578_v50 }
 0x2e9   : > { %v1581_v9 = vpop.f32.mrf.mxu2 }
 0x2ea   : > { %1660 = vst.msk [vmem:[%s2878_s15 + $0x1c8] sm:$0xff] %vm1602_vm2, %v1581_v9 }
 0x2f1   : > { %v1584_v10 = vpop.f32.mrf.mxu2 }
 0x2f2   : > { %1661 = vst.msk [vmem:[%s2878_s15 + $0x1d0] sm:$0xff] %vm1602_vm2, %v1584_v10 }
 0x2f9   : > { %v1587_v6 = vpop.f32.mrf.mxu2 }
 0x2fa   : > { %1662 = vst.msk [vmem:[%s2878_s15 + $0x1d8] sm:$0xff] %vm1602_vm2, %v1587_v6 }
 0x301   : > { %v1590_v53 = vpop.f32.mrf.mxu2 }
 0x302   : > { %1663 = vst.msk [vmem:[%s2878_s15 + $0x1e0] sm:$0xff] %vm1602_vm2, %v1590_v53 }
 0x306   : > { %1673 = sbr.rel (!%p2511_p4) target bundleno = 843 (0x34b), region = 40 }
 0x309   : > { %v1593_v21 = vpop.f32.mrf.mxu2 }
 0x30a   : > { %1664 = vst.msk [vmem:[%s2878_s15 + $0x1e8] sm:$0xff] %vm1602_vm2, %v1593_v21 }
 0x30b   : > { %s3336_s13 = smov (!%p1676_p8, %s1675_s13), 64 }
 0x30c   : > { %s2222_s7 = sshll.u32 %s3336_s13, 3 }
 0x30d   : > { %p2225_p9 = scmp.eq.s32.totalorder %s2222_s7, 0 }
 0x30e   : > { %s3178_s8 = sshrl.u32 (!%p2225_p9), %s3336_s13, 5 }
 0x30f   : > { %1684 = sbr.rel (%p2225_p9) target bundleno = 843 (0x34b), region = 44  ;;  %p2226_p10 = scmp.le.s32.totalorder (!%p2225_p9), %s3178_s8, 0 }
 0x314   : > { %1969 = sbr.rel (%p2226_p10) target bundleno = 826 (0x33a), region = 123  ;;  %s3327_s18 = smov (!%p2226_p10), %s3172_s6 }
 0x315   : > { %s3328_s23 = smov (!%p2226_p10), %s2878_s15  ;;  %s3187_s28 = smov (!%p2226_p10), 0  }
 0x316   : > { %s3189_s9 = smov (!%p2226_p10), 0  }
 0x319 LB: >> { %v1809_v22 = vld [vmem:[%s2434_s23] sm:$0xff]  ;;  %v1811_v24 = vld [vmem:[%s2434_s23 + $0x8] sm:$0xff]  ;;  %v1813_v37 = vld [vmem:[%s2434_s23 + $0x10] sm:$0xff]  ;;  %s1873_s10 = sadd.s32 1, %s2438_s28  ;;  %s1803_s9 = sadd.s32 1, %s2442_s9   ;;  %s2442_s9 = sphi %s3189_s9, %s1803_s9   ;;  %s2438_s28 = sphi %s3187_s28, %s3331_s28   ;;  %s2434_s23 = sphi %s3328_s23, %s3330_s23   ;;  %s2430_s18 = sphi %s3327_s18, %s3329_s18  }
 0x31a   : >> { %1810 = vst [vmem:[%s2430_s18] sm:$0xff] %v1809_v22  ;;  %v1815_v38 = vld [vmem:[%s2434_s23 + $0x18] sm:$0xff]  ;;  %p1874_p11 = scmp.ge.s32.totalorder %s1873_s10, %s3178_s8  ;;  %v1817_v27 = vld [vmem:[%s2434_s23 + $0x20] sm:$0xff]  ;;  %v1819_v61 = vld [vmem:[%s2434_s23 + $0x28] sm:$0xff]  ;;  %p1802_p12 = scmp.ge.s32.totalorder %s1803_s9, %s3178_s8 }
 0x31b   : >> { %1812 = vst [vmem:[%s2430_s18 + $0x8] sm:$0xff] %v1811_v24  ;;  %v1821_v63 = vld [vmem:[%s2434_s23 + $0x30] sm:$0xff]  ;;  %v1823_v28 = vld [vmem:[%s2434_s23 + $0x38] sm:$0xff]  ;;  %v1825_v14 = vld [vmem:[%s2434_s23 + $0x40] sm:$0xff] }
 0x31c   : >> { %1814 = vst [vmem:[%s2430_s18 + $0x10] sm:$0xff] %v1813_v37  ;;  %s3338_s10 = smov (%p1874_p11, %s1873_s10), 0  ;;  %v1827_v17 = vld [vmem:[%s2434_s23 + $0x48] sm:$0xff]  ;;  %v1829_v45 = vld [vmem:[%s2434_s23 + $0x50] sm:$0xff]  ;;  %v1831_v31 = vld [vmem:[%s2434_s23 + $0x58] sm:$0xff] }
 0x31d   : >> { %1816 = vst [vmem:[%s2430_s18 + $0x18] sm:$0xff] %v1815_v38  ;;  %s2227_s11 = sshll.u32 %s3338_s10, 8  ;;  %v1833_v32 = vld [vmem:[%s2434_s23 + $0x60] sm:$0xff]  ;;  %v1835_v39 = vld [vmem:[%s2434_s23 + $0x68] sm:$0xff]  ;;  %v1837_v46 = vld [vmem:[%s2434_s23 + $0x70] sm:$0xff]  ;;  %s3331_s28 = smov %s3338_s10 }
 0x31e   : >> { %1818 = vst [vmem:[%s2430_s18 + $0x20] sm:$0xff] %v1817_v27  ;;  %s3221_s12 = scalar_lea.vmem %s2878_s15, %s2227_s11 [#allocation2]   ;;  %s3224_s14 = scalar_lea.vmem %s3172_s6, %s2227_s11   ;;  %v1839_v47 = vld [vmem:[%s2434_s23 + $0x78] sm:$0xff]  ;;  %v1841_v40 = vld [vmem:[%s2434_s23 + $0x80] sm:$0xff]  ;;  %v1843_v0 = vld [vmem:[%s2434_s23 + $0x88] sm:$0xff] }
 0x31f   : >> { %1820 = vst [vmem:[%s2430_s18 + $0x28] sm:$0xff] %v1819_v61  ;;  %v1845_v1 = vld [vmem:[%s2434_s23 + $0x90] sm:$0xff]  ;;  %v1847_v20 = vld [vmem:[%s2434_s23 + $0x98] sm:$0xff]  ;;  %v1849_v18 = vld [vmem:[%s2434_s23 + $0xa0] sm:$0xff] }
 0x320   : >> { %1822 = vst [vmem:[%s2430_s18 + $0x30] sm:$0xff] %v1821_v63  ;;  %v1851_v19 = vld [vmem:[%s2434_s23 + $0xa8] sm:$0xff]  ;;  %v1853_v51 = vld [vmem:[%s2434_s23 + $0xb0] sm:$0xff]  ;;  %v1855_v35 = vld [vmem:[%s2434_s23 + $0xb8] sm:$0xff] }
 0x321   : >> { %1824 = vst [vmem:[%s2430_s18 + $0x38] sm:$0xff] %v1823_v28  ;;  %v1857_v36 = vld [vmem:[%s2434_s23 + $0xc0] sm:$0xff]  ;;  %v1859_v52 = vld [vmem:[%s2434_s23 + $0xc8] sm:$0xff]  ;;  %v1861_v33 = vld [vmem:[%s2434_s23 + $0xd0] sm:$0xff] }
 0x322   : >> { %1826 = vst [vmem:[%s2430_s18 + $0x40] sm:$0xff] %v1825_v14  ;;  %v1863_v54 = vld [vmem:[%s2434_s23 + $0xd8] sm:$0xff]  ;;  %v1865_v2 = vld [vmem:[%s2434_s23 + $0xe0] sm:$0xff]  ;;  %v1867_v4 = vld [vmem:[%s2434_s23 + $0xe8] sm:$0xff] }
 0x323   : >> { %1828 = vst [vmem:[%s2430_s18 + $0x48] sm:$0xff] %v1827_v17  ;;  %v1869_v3 = vld [vmem:[%s2434_s23 + $0xf0] sm:$0xff]  ;;  %v1871_v55 = vld [vmem:[%s2434_s23 + $0xf8] sm:$0xff]  ;;  %s3330_s23 = smov %s3221_s12 }
 0x324   : >> { %1830 = vst [vmem:[%s2430_s18 + $0x50] sm:$0xff] %v1829_v45 }
 0x325   : >> { %1832 = vst [vmem:[%s2430_s18 + $0x58] sm:$0xff] %v1831_v31 }
 0x326   : >> { %1834 = vst [vmem:[%s2430_s18 + $0x60] sm:$0xff] %v1833_v32 }
 0x327   : >> { %1836 = vst [vmem:[%s2430_s18 + $0x68] sm:$0xff] %v1835_v39 }
 0x328   : >> { %1838 = vst [vmem:[%s2430_s18 + $0x70] sm:$0xff] %v1837_v46 }
 0x329   : >> { %1840 = vst [vmem:[%s2430_s18 + $0x78] sm:$0xff] %v1839_v47 }
 0x32a   : >> { %1842 = vst [vmem:[%s2430_s18 + $0x80] sm:$0xff] %v1841_v40 }
 0x32b   : >> { %1844 = vst [vmem:[%s2430_s18 + $0x88] sm:$0xff] %v1843_v0 }
 0x32c   : >> { %1846 = vst [vmem:[%s2430_s18 + $0x90] sm:$0xff] %v1845_v1 }
 0x32d   : >> { %1848 = vst [vmem:[%s2430_s18 + $0x98] sm:$0xff] %v1847_v20 }
 0x32e   : >> { %1850 = vst [vmem:[%s2430_s18 + $0xa0] sm:$0xff] %v1849_v18 }
 0x32f   : >> { %1852 = vst [vmem:[%s2430_s18 + $0xa8] sm:$0xff] %v1851_v19 }
 0x330   : >> { %1854 = vst [vmem:[%s2430_s18 + $0xb0] sm:$0xff] %v1853_v51 }
 0x331   : >> { %1856 = vst [vmem:[%s2430_s18 + $0xb8] sm:$0xff] %v1855_v35 }
 0x332   : >> { %1858 = vst [vmem:[%s2430_s18 + $0xc0] sm:$0xff] %v1857_v36 }
 0x333   : >> { %1860 = vst [vmem:[%s2430_s18 + $0xc8] sm:$0xff] %v1859_v52 }
 0x334   : >> { %1862 = vst [vmem:[%s2430_s18 + $0xd0] sm:$0xff] %v1861_v33 }
 0x335   : >> { %1864 = vst [vmem:[%s2430_s18 + $0xd8] sm:$0xff] %v1863_v54  ;;  %1805 = sbr.rel (!%p1802_p12) target bundleno = 793 (0x319), region = 129 }
 0x336   : >> { %1866 = vst [vmem:[%s2430_s18 + $0xe0] sm:$0xff] %v1865_v2 }
 0x337   : >> { %1868 = vst [vmem:[%s2430_s18 + $0xe8] sm:$0xff] %v1867_v4 }
 0x338   : >> { %1870 = vst [vmem:[%s2430_s18 + $0xf0] sm:$0xff] %v1869_v3 }
 0x339   : >> { %1872 = vst [vmem:[%s2430_s18 + $0xf8] sm:$0xff] %v1871_v55  ;;  %s3329_s18 = smov %s3224_s14 }
 0x33a PF: > { %s3289_s17 = sand.u32 31, %s3336_s13   ;;  %s2238_s20 = sshll.u32 %s3178_s8, 8 }
 0x33b   : > { %s1884_s21 = scalar_lea.vmem %s2878_s15, %s2238_s20 [#allocation2]   ;;  %s1886_s24 = scalar_lea.vmem %s3172_s6, %s2238_s20  }
 0x33c   : > { %p2232_p13 = scmp.le.s32.totalorder %s3289_s17, 0 }
 0x33d   : > { %s2444_s25 = smov (!%p2232_p13), %s1886_s24   ;;  %s2448_s27 = smov (!%p2232_p13), %s1884_s21  }
 0x33e   : > { %1983 = sbr.rel (%p2232_p13) target bundleno = 843 (0x34b), region = 134  ;;  %s2452_s29 = smov (!%p2232_p13), 0  }
 0x33f   : > { %s2456_s26 = smov (!%p2232_p13), 0  }
 0x343 LB: >> { %v1896_v23 = vld [vmem:[%s2450_s27] sm:$0xff]  ;;  %s1898_s13 = sadd.s32 1, %s2454_s29  ;;  %s1890_s26 = sadd.s32 1, %s2458_s26   ;;  %s2458_s26 = sphi %s2456_s26, %s1890_s26   ;;  %s2454_s29 = sphi %s2452_s29, %s2453_s29   ;;  %s2450_s27 = sphi %s2448_s27, %s1903_s27   ;;  %s2446_s25 = sphi %s2444_s25, %s1904_s25  }
 0x344   : >> { %1897 = vst [vmem:[%s2446_s25] sm:$0xff] %v1896_v23  ;;  %p1899_p0 = scmp.ge.s32.totalorder %s1898_s13, %s3289_s17  ;;  %p1889_p1 = scmp.ge.s32.totalorder %s1890_s26, %s3289_s17 }
 0x346   : >> { %s3340_s13 = smov (%p1899_p0, %s1898_s13), 0  ;;  %1892 = sbr.rel (!%p1889_p1) target bundleno = 835 (0x343), region = 140 }
 0x347   : >> { %s2233_s15 = sshll.u32 %s3340_s13, 3  ;;  %s2453_s29 = smov %s3340_s13  }
 0x348   : >> { %s1903_s27 = scalar_lea.vmem %s1884_s21, %s2233_s15 [#allocation2]   ;;  %s1904_s25 = scalar_lea.vmem %s1886_s24, %s2233_s15  }
 0x34b PF: > { %p11_p2 = scmp.ge.s32.totalorder %s2501_s19, 4   ;;  %s3332_s15 = smov %s2422_s16 }
 0x34c   : > { %s3333_s16 = smov %s2509_s22  ;;  %s3334_s17 = smov %s2501_s19 }
 0x34d   :  { %13 = sbr.rel (!%p11_p2) target bundleno = 2 (0x2), region = 151 }

</bundles_post_ra>
